<compile_context>
chip_gen: v5e
topology: v5e:2x2
jax: 0.10.0
libtpu: 0.0.40
codegen_flags: <defaults>
</compile_context>

<pallas_src>
import math

import numpy as np

import jax
import jax.numpy as jnp
from jax.experimental import pallas as pl
from jax.experimental.pallas import tpu as pltpu


# ---------------------------------------------------------------------------
# Host-side helpers
# ---------------------------------------------------------------------------

def _nearest_src_indices(out_size, in_size):
    """PyTorch 'nearest' rule, exact integer arithmetic: src = (dst*in)//out."""
    dst = np.arange(out_size, dtype=np.int64)
    return np.minimum((dst * in_size) // out_size, in_size - 1)


def _runs(src):
    """Run-length encode a (monotone) source-index vector.

    Returns a list of (src_index, out_start, count): output positions
    [out_start, out_start + count) all copy from input position src_index.
    """
    runs = []
    n = len(src)
    start = 0
    while start < n:
        end = start + 1
        while end < n and src[end] == src[start]:
            end += 1
        runs.append((int(src[start]), start, end - start))
        start = end
    return runs


def _resolve_output_size(in_hw, size, scale_factor):
    h_in, w_in = in_hw
    if size is not None:
        if isinstance(size, (tuple, list)):
            return int(size[0]), int(size[1])
        return int(size), int(size)
    sf = scale_factor
    if not isinstance(sf, (tuple, list)):
        sf = (sf, sf)
    # PyTorch: output = floor(input * scale_factor), computed in double.
    return (int(math.floor(h_in * float(sf[0]))),
            int(math.floor(w_in * float(sf[1]))))


def _vmem_capacity_bytes():
    """Generation-aware VMEM capacity (128 MiB on v5e/v6e, 64 MiB on v7x)."""
    try:
        info = pltpu.get_tpu_info()
    except Exception:
        return 64 * 1024 * 1024
    for name in ("vmem_capacity_bytes", "vmem_size_bytes", "vmem_bytes"):
        val = getattr(info, name, None)
        if val:
            return int(val)
    return 64 * 1024 * 1024  # conservative: v7x per-TC VMEM


def _padded_plane_bytes(h, w, itemsize):
    """VMEM bytes of one (h, w) plane after (sublane, 128-lane) tiling."""
    sublane = {4: 8, 2: 16, 1: 32}.get(itemsize, 8)
    return (-(-h // sublane) * sublane) * (-(-w // 128) * 128) * itemsize


def _choose_channel_block(b, per_channel_bytes, budget_bytes):
    """Largest channel block whose per-step VMEM footprint fits the budget.

    Prefers an even number (>= 2) of grid steps so the "parallel" grid axis
    can shard across both v7x TensorCores (no effect on 1-TC v5e/v6e).
    """
    max_fit = max(1, int(budget_bytes // max(1, per_channel_bytes)))
    c_blk = min(b, max_fit)
    if b > 1:
        steps = pl.cdiv(b, c_blk)
        target_steps = max(2, steps + (steps % 2))   # round up to even, >= 2
        c_blk = min(c_blk, pl.cdiv(b, target_steps))
    return max(1, c_blk)


# ---------------------------------------------------------------------------
# Kernel factory (replication only -- no matmul, no selection matrices)
# ---------------------------------------------------------------------------

def _make_nearest_kernel(c_blk, h_in, w_in, h_out, w_out,
                         h_runs, w_runs, h_identity, w_identity):
    """Build the replication kernel; returns (kernel_fn, needs_mid_scratch).

    All run lists are compile-time constants, so every slice/store below has
    static bounds; replication is lane/sublane broadcasts feeding plain
    vector stores (VPU/XLU/store-slot work that is free in an HBM-bound
    kernel -- the MXU is never touched).
    """

    def copy_kernel(x_ref, o_ref):
        o_ref[...] = x_ref[...]

    def w_only_kernel(x_ref, o_ref):
        # Replicate along W (lane axis) straight into the output block.
        for (j, w0, wc) in w_runs:
            col = x_ref[:, :, j:j + 1]                      # (c_blk, h_in, 1)
            o_ref[:, :, w0:w0 + wc] = jnp.broadcast_to(col, (c_blk, h_in, wc))

    def h_only_kernel(x_ref, o_ref):
        # Replicate along H (sublane axis) straight into the output block.
        for (i, h0, hc) in h_runs:
            row = x_ref[:, i:i + 1, :]                      # (c_blk, 1, w_in)
            o_ref[:, h0:h0 + hc, :] = jnp.broadcast_to(row, (c_blk, hc, w_in))

    def hw_kernel(x_ref, o_ref, mid_ref):
        # Stage 1: W replication into the VMEM scratch (c_blk, h_in, w_out).
        for (j, w0, wc) in w_runs:
            col = x_ref[:, :, j:j + 1]                      # (c_blk, h_in, 1)
            mid_ref[:, :, w0:w0 + wc] = jnp.broadcast_to(col, (c_blk, h_in, wc))
        # Stage 2: H replication from the scratch into the output block.
        for (i, h0, hc) in h_runs:
            row = mid_ref[:, i:i + 1, :]                    # (c_blk, 1, w_out)
            o_ref[:, h0:h0 + hc, :] = jnp.broadcast_to(row, (c_blk, hc, w_out))

    if w_identity and h_identity:
        return copy_kernel, False
    if h_identity:
        return w_only_kernel, False
    if w_identity:
        return h_only_kernel, False
    return hw_kernel, True


# ---------------------------------------------------------------------------
# Wrapper
# ---------------------------------------------------------------------------

def nearest_interpolate(x, size=None, scale_factor=None):
    n, c, h_in, w_in = x.shape
    h_out, w_out = _resolve_output_size((h_in, w_in), size, scale_factor)
    b = n * c
    itemsize = jnp.dtype(x.dtype).itemsize

    src_h = _nearest_src_indices(h_out, h_in)
    src_w = _nearest_src_indices(w_out, w_in)
    h_identity = (h_out == h_in) and bool(np.all(src_h == np.arange(h_in)))
    w_identity = (w_out == w_in) and bool(np.all(src_w == np.arange(w_in)))
    h_runs = _runs(src_h)
    w_runs = _runs(src_w)

    # Generation-aware VMEM sizing.
    vmem_cap = _vmem_capacity_bytes()
    block_budget = int(0.45 * vmem_cap)
    vmem_limit = int(0.75 * vmem_cap)

    in_plane = _padded_plane_bytes(h_in, w_in, itemsize)
    out_plane = _padded_plane_bytes(h_out, w_out, itemsize)
    mid_plane = 0 if w_identity else _padded_plane_bytes(h_in, w_out, itemsize)
    # Double-buffered in/out blocks + single-buffered scratch + headroom for
    # live values / compiler scratch.
    per_channel_bytes = 2 * in_plane + 3 * out_plane + mid_plane

    c_blk = _choose_channel_block(b, per_channel_bytes, block_budget)
    grid = (pl.cdiv(b, c_blk),)

    kernel, needs_mid = _make_nearest_kernel(
        c_blk, h_in, w_in, h_out, w_out, h_runs, w_runs,
        h_identity, w_identity)
    scratch_shapes = (
        [pltpu.VMEM((c_blk, h_in, w_out), x.dtype)] if needs_mid else [])

    xr = x.reshape(b, h_in, w_in)   # free row-major reshape on the host

    out = pl.pallas_call(
        kernel,
        out_shape=jax.ShapeDtypeStruct((b, h_out, w_out), x.dtype),
        grid_spec=pltpu.PrefetchScalarGridSpec(
            num_scalar_prefetch=0,
            grid=grid,
            in_specs=[pl.BlockSpec((c_blk, h_in, w_in), lambda i: (i, 0, 0))],
            out_specs=pl.BlockSpec((c_blk, h_out, w_out), lambda i: (i, 0, 0)),
            scratch_shapes=scratch_shapes,
        ),
        compiler_params=pltpu.CompilerParams(
            dimension_semantics=("parallel",),
            vmem_limit_bytes=vmem_limit,
        ),
        cost_estimate=pl.CostEstimate(
            flops=0,
            transcendentals=0,
            bytes_accessed=b * (h_in * w_in + h_out * w_out) * itemsize,
        ),
    )(xr)
    return out.reshape(n, c, h_out, w_out)


class Interpolate:
    """JAX/Pallas equivalent of the PyTorch Interpolate module (mode='nearest')."""

    def __init__(self, size=None, scale_factor=None, mode='nearest',
                 align_corners=False):
        assert mode == 'nearest', "only mode='nearest' is implemented"
        # align_corners is ignored by PyTorch for mode='nearest'.
        self.size = size
        self.scale_factor = scale_factor
        self.mode = mode
        self.align_corners = align_corners

    def __call__(self, x):
        return nearest_interpolate(x, size=self.size,
                                   scale_factor=self.scale_factor)


if __name__ == "__main__":
    key = jax.random.PRNGKey(0)
    # Small NCHW input, nearest upsampling by 2x (module defaults + scale_factor=2).
    x = jax.random.normal(key, (2, 4, 16, 16), dtype=jnp.float32)

    model = Interpolate(scale_factor=2, mode='nearest')
    y = jax.block_until_ready(model(x))

    # Pure-JAX reference (same PyTorch nearest index rule) for sanity check.
    N, C, H_in, W_in = x.shape
    H_out, W_out = y.shape[2], y.shape[3]
    src_h = _nearest_src_indices(H_out, H_in)
    src_w = _nearest_src_indices(W_out, W_in)
    ref = x[:, :, src_h, :][:, :, :, src_w]

    assert y.shape == (2, 4, 32, 32), y.shape
    # Replication path is a pure copy, so the match must be bit-exact.
    assert jnp.array_equal(y, ref), "mismatch vs reference nearest interpolation"
    print("KERNEL_OK")
</pallas_src>

<mosaic_0001>
module attributes {stable_mosaic.version = 11 : i64} {
  func.func @hw_kernel(%arg0: i32, %arg1: memref<4x16x16xf32, #tpu.memory_space<vmem>>, %arg2: memref<4x32x32xf32, #tpu.memory_space<vmem>>, %arg3: memref<4x16x32xf32, #tpu.memory_space<vmem>>) attributes {dimension_semantics = [#tpu.dimension_semantics<parallel>], iteration_bounds = array<i64: 2>, scalar_prefetch = 0 : i64, scratch_operands = 1 : i64, tpu.core_type = #tpu.core_type<tc>, window_params = [{transform_indices = @transform_0, window_bounds = array<i64: 4, 16, 16>}, {transform_indices = @transform_1, window_bounds = array<i64: 4, 32, 32>}]} {
    %c0 = arith.constant 0 : index
    %c0_0 = arith.constant 0 : index
    %c0_1 = arith.constant 0 : index
    %0 = vector.load %arg1[%c0, %c0_0, %c0_1] : memref<4x16x16xf32, #tpu.memory_space<vmem>>, vector<4x16x1xf32>
    %1 = vector.shape_cast %0 : vector<4x16x1xf32> to vector<4x16x1xf32>
    %2 = vector.broadcast %1 : vector<4x16x1xf32> to vector<4x16x2xf32>
    %c0_2 = arith.constant 0 : index
    %c0_3 = arith.constant 0 : index
    %c0_4 = arith.constant 0 : index
    %3 = vector.load %arg3[%c0_2, %c0_3, %c0_4] : memref<4x16x32xf32, #tpu.memory_space<vmem>>, vector<4x16x2xf32>
    tpu.vector_store %arg3[%c0_2, %c0_3, %c0_4], %2 {strides = array<i32>} : memref<4x16x32xf32, #tpu.memory_space<vmem>>, vector<4x16x2xf32>,
    %c0_5 = arith.constant 0 : index
    %c0_6 = arith.constant 0 : index
    %c1 = arith.constant 1 : index
    %4 = vector.load %arg1[%c0_5, %c0_6, %c1] : memref<4x16x16xf32, #tpu.memory_space<vmem>>, vector<4x16x1xf32>
    %5 = vector.shape_cast %4 : vector<4x16x1xf32> to vector<4x16x1xf32>
    %6 = vector.broadcast %5 : vector<4x16x1xf32> to vector<4x16x2xf32>
    %c0_7 = arith.constant 0 : index
    %c0_8 = arith.constant 0 : index
    %c2 = arith.constant 2 : index
    %7 = vector.load %arg3[%c0_7, %c0_8, %c2] : memref<4x16x32xf32, #tpu.memory_space<vmem>>, vector<4x16x2xf32>
    tpu.vector_store %arg3[%c0_7, %c0_8, %c2], %6 {strides = array<i32>} : memref<4x16x32xf32, #tpu.memory_space<vmem>>, vector<4x16x2xf32>,
    %c0_9 = arith.constant 0 : index
    %c0_10 = arith.constant 0 : index
    %c2_11 = arith.constant 2 : index
    %8 = vector.load %arg1[%c0_9, %c0_10, %c2_11] : memref<4x16x16xf32, #tpu.memory_space<vmem>>, vector<4x16x1xf32>
    %9 = vector.shape_cast %8 : vector<4x16x1xf32> to vector<4x16x1xf32>
    %10 = vector.broadcast %9 : vector<4x16x1xf32> to vector<4x16x2xf32>
    %c0_12 = arith.constant 0 : index
    %c0_13 = arith.constant 0 : index
    %c4 = arith.constant 4 : index
    %11 = vector.load %arg3[%c0_12, %c0_13, %c4] : memref<4x16x32xf32, #tpu.memory_space<vmem>>, vector<4x16x2xf32>
    tpu.vector_store %arg3[%c0_12, %c0_13, %c4], %10 {strides = array<i32>} : memref<4x16x32xf32, #tpu.memory_space<vmem>>, vector<4x16x2xf32>,
    %c0_14 = arith.constant 0 : index
    %c0_15 = arith.constant 0 : index
    %c3 = arith.constant 3 : index
    %12 = vector.load %arg1[%c0_14, %c0_15, %c3] : memref<4x16x16xf32, #tpu.memory_space<vmem>>, vector<4x16x1xf32>
    %13 = vector.shape_cast %12 : vector<4x16x1xf32> to vector<4x16x1xf32>
    %14 = vector.broadcast %13 : vector<4x16x1xf32> to vector<4x16x2xf32>
    %c0_16 = arith.constant 0 : index
    %c0_17 = arith.constant 0 : index
    %c6 = arith.constant 6 : index
    %15 = vector.load %arg3[%c0_16, %c0_17, %c6] : memref<4x16x32xf32, #tpu.memory_space<vmem>>, vector<4x16x2xf32>
    tpu.vector_store %arg3[%c0_16, %c0_17, %c6], %14 {strides = array<i32>} : memref<4x16x32xf32, #tpu.memory_space<vmem>>, vector<4x16x2xf32>,
    %c0_18 = arith.constant 0 : index
    %c0_19 = arith.constant 0 : index
    %c4_20 = arith.constant 4 : index
    %16 = vector.load %arg1[%c0_18, %c0_19, %c4_20] : memref<4x16x16xf32, #tpu.memory_space<vmem>>, vector<4x16x1xf32>
    %17 = vector.shape_cast %16 : vector<4x16x1xf32> to vector<4x16x1xf32>
    %18 = vector.broadcast %17 : vector<4x16x1xf32> to vector<4x16x2xf32>
    %c0_21 = arith.constant 0 : index
    %c0_22 = arith.constant 0 : index
    %c8 = arith.constant 8 : index
    %19 = vector.load %arg3[%c0_21, %c0_22, %c8] : memref<4x16x32xf32, #tpu.memory_space<vmem>>, vector<4x16x2xf32>
    tpu.vector_store %arg3[%c0_21, %c0_22, %c8], %18 {strides = array<i32>} : memref<4x16x32xf32, #tpu.memory_space<vmem>>, vector<4x16x2xf32>,
    %c0_23 = arith.constant 0 : index
    %c0_24 = arith.constant 0 : index
    %c5 = arith.constant 5 : index
    %20 = vector.load %arg1[%c0_23, %c0_24, %c5] : memref<4x16x16xf32, #tpu.memory_space<vmem>>, vector<4x16x1xf32>
    %21 = vector.shape_cast %20 : vector<4x16x1xf32> to vector<4x16x1xf32>
    %22 = vector.broadcast %21 : vector<4x16x1xf32> to vector<4x16x2xf32>
    %c0_25 = arith.constant 0 : index
    %c0_26 = arith.constant 0 : index
    %c10 = arith.constant 10 : index
    %23 = vector.load %arg3[%c0_25, %c0_26, %c10] : memref<4x16x32xf32, #tpu.memory_space<vmem>>, vector<4x16x2xf32>
    tpu.vector_store %arg3[%c0_25, %c0_26, %c10], %22 {strides = array<i32>} : memref<4x16x32xf32, #tpu.memory_space<vmem>>, vector<4x16x2xf32>,
    %c0_27 = arith.constant 0 : index
    %c0_28 = arith.constant 0 : index
    %c6_29 = arith.constant 6 : index
    %24 = vector.load %arg1[%c0_27, %c0_28, %c6_29] : memref<4x16x16xf32, #tpu.memory_space<vmem>>, vector<4x16x1xf32>
    %25 = vector.shape_cast %24 : vector<4x16x1xf32> to vector<4x16x1xf32>
    %26 = vector.broadcast %25 : vector<4x16x1xf32> to vector<4x16x2xf32>
    %c0_30 = arith.constant 0 : index
    %c0_31 = arith.constant 0 : index
    %c12 = arith.constant 12 : index
    %27 = vector.load %arg3[%c0_30, %c0_31, %c12] : memref<4x16x32xf32, #tpu.memory_space<vmem>>, vector<4x16x2xf32>
    tpu.vector_store %arg3[%c0_30, %c0_31, %c12], %26 {strides = array<i32>} : memref<4x16x32xf32, #tpu.memory_space<vmem>>, vector<4x16x2xf32>,
    %c0_32 = arith.constant 0 : index
    %c0_33 = arith.constant 0 : index
    %c7 = arith.constant 7 : index
    %28 = vector.load %arg1[%c0_32, %c0_33, %c7] : memref<4x16x16xf32, #tpu.memory_space<vmem>>, vector<4x16x1xf32>
    %29 = vector.shape_cast %28 : vector<4x16x1xf32> to vector<4x16x1xf32>
    %30 = vector.broadcast %29 : vector<4x16x1xf32> to vector<4x16x2xf32>
    %c0_34 = arith.constant 0 : index
    %c0_35 = arith.constant 0 : index
    %c14 = arith.constant 14 : index
    %31 = vector.load %arg3[%c0_34, %c0_35, %c14] : memref<4x16x32xf32, #tpu.memory_space<vmem>>, vector<4x16x2xf32>
    tpu.vector_store %arg3[%c0_34, %c0_35, %c14], %30 {strides = array<i32>} : memref<4x16x32xf32, #tpu.memory_space<vmem>>, vector<4x16x2xf32>,
    %c0_36 = arith.constant 0 : index
    %c0_37 = arith.constant 0 : index
    %c8_38 = arith.constant 8 : index
    %32 = vector.load %arg1[%c0_36, %c0_37, %c8_38] : memref<4x16x16xf32, #tpu.memory_space<vmem>>, vector<4x16x1xf32>
    %33 = vector.shape_cast %32 : vector<4x16x1xf32> to vector<4x16x1xf32>
    %34 = vector.broadcast %33 : vector<4x16x1xf32> to vector<4x16x2xf32>
    %c0_39 = arith.constant 0 : index
    %c0_40 = arith.constant 0 : index
    %c16 = arith.constant 16 : index
    %35 = vector.load %arg3[%c0_39, %c0_40, %c16] : memref<4x16x32xf32, #tpu.memory_space<vmem>>, vector<4x16x2xf32>
    tpu.vector_store %arg3[%c0_39, %c0_40, %c16], %34 {strides = array<i32>} : memref<4x16x32xf32, #tpu.memory_space<vmem>>, vector<4x16x2xf32>,
    %c0_41 = arith.constant 0 : index
    %c0_42 = arith.constant 0 : index
    %c9 = arith.constant 9 : index
    %36 = vector.load %arg1[%c0_41, %c0_42, %c9] : memref<4x16x16xf32, #tpu.memory_space<vmem>>, vector<4x16x1xf32>
    %37 = vector.shape_cast %36 : vector<4x16x1xf32> to vector<4x16x1xf32>
    %38 = vector.broadcast %37 : vector<4x16x1xf32> to vector<4x16x2xf32>
    %c0_43 = arith.constant 0 : index
    %c0_44 = arith.constant 0 : index
    %c18 = arith.constant 18 : index
    %39 = vector.load %arg3[%c0_43, %c0_44, %c18] : memref<4x16x32xf32, #tpu.memory_space<vmem>>, vector<4x16x2xf32>
    tpu.vector_store %arg3[%c0_43, %c0_44, %c18], %38 {strides = array<i32>} : memref<4x16x32xf32, #tpu.memory_space<vmem>>, vector<4x16x2xf32>,
    %c0_45 = arith.constant 0 : index
    %c0_46 = arith.constant 0 : index
    %c10_47 = arith.constant 10 : index
    %40 = vector.load %arg1[%c0_45, %c0_46, %c10_47] : memref<4x16x16xf32, #tpu.memory_space<vmem>>, vector<4x16x1xf32>
    %41 = vector.shape_cast %40 : vector<4x16x1xf32> to vector<4x16x1xf32>
    %42 = vector.broadcast %41 : vector<4x16x1xf32> to vector<4x16x2xf32>
    %c0_48 = arith.constant 0 : index
    %c0_49 = arith.constant 0 : index
    %c20 = arith.constant 20 : index
    %43 = vector.load %arg3[%c0_48, %c0_49, %c20] : memref<4x16x32xf32, #tpu.memory_space<vmem>>, vector<4x16x2xf32>
    tpu.vector_store %arg3[%c0_48, %c0_49, %c20], %42 {strides = array<i32>} : memref<4x16x32xf32, #tpu.memory_space<vmem>>, vector<4x16x2xf32>,
    %c0_50 = arith.constant 0 : index
    %c0_51 = arith.constant 0 : index
    %c11 = arith.constant 11 : index
    %44 = vector.load %arg1[%c0_50, %c0_51, %c11] : memref<4x16x16xf32, #tpu.memory_space<vmem>>, vector<4x16x1xf32>
    %45 = vector.shape_cast %44 : vector<4x16x1xf32> to vector<4x16x1xf32>
    %46 = vector.broadcast %45 : vector<4x16x1xf32> to vector<4x16x2xf32>
    %c0_52 = arith.constant 0 : index
    %c0_53 = arith.constant 0 : index
    %c22 = arith.constant 22 : index
    %47 = vector.load %arg3[%c0_52, %c0_53, %c22] : memref<4x16x32xf32, #tpu.memory_space<vmem>>, vector<4x16x2xf32>
    tpu.vector_store %arg3[%c0_52, %c0_53, %c22], %46 {strides = array<i32>} : memref<4x16x32xf32, #tpu.memory_space<vmem>>, vector<4x16x2xf32>,
    %c0_54 = arith.constant 0 : index
    %c0_55 = arith.constant 0 : index
    %c12_56 = arith.constant 12 : index
    %48 = vector.load %arg1[%c0_54, %c0_55, %c12_56] : memref<4x16x16xf32, #tpu.memory_space<vmem>>, vector<4x16x1xf32>
    %49 = vector.shape_cast %48 : vector<4x16x1xf32> to vector<4x16x1xf32>
    %50 = vector.broadcast %49 : vector<4x16x1xf32> to vector<4x16x2xf32>
    %c0_57 = arith.constant 0 : index
    %c0_58 = arith.constant 0 : index
    %c24 = arith.constant 24 : index
    %51 = vector.load %arg3[%c0_57, %c0_58, %c24] : memref<4x16x32xf32, #tpu.memory_space<vmem>>, vector<4x16x2xf32>
    tpu.vector_store %arg3[%c0_57, %c0_58, %c24], %50 {strides = array<i32>} : memref<4x16x32xf32, #tpu.memory_space<vmem>>, vector<4x16x2xf32>,
    %c0_59 = arith.constant 0 : index
    %c0_60 = arith.constant 0 : index
    %c13 = arith.constant 13 : index
    %52 = vector.load %arg1[%c0_59, %c0_60, %c13] : memref<4x16x16xf32, #tpu.memory_space<vmem>>, vector<4x16x1xf32>
    %53 = vector.shape_cast %52 : vector<4x16x1xf32> to vector<4x16x1xf32>
    %54 = vector.broadcast %53 : vector<4x16x1xf32> to vector<4x16x2xf32>
    %c0_61 = arith.constant 0 : index
    %c0_62 = arith.constant 0 : index
    %c26 = arith.constant 26 : index
    %55 = vector.load %arg3[%c0_61, %c0_62, %c26] : memref<4x16x32xf32, #tpu.memory_space<vmem>>, vector<4x16x2xf32>
    tpu.vector_store %arg3[%c0_61, %c0_62, %c26], %54 {strides = array<i32>} : memref<4x16x32xf32, #tpu.memory_space<vmem>>, vector<4x16x2xf32>,
    %c0_63 = arith.constant 0 : index
    %c0_64 = arith.constant 0 : index
    %c14_65 = arith.constant 14 : index
    %56 = vector.load %arg1[%c0_63, %c0_64, %c14_65] : memref<4x16x16xf32, #tpu.memory_space<vmem>>, vector<4x16x1xf32>
    %57 = vector.shape_cast %56 : vector<4x16x1xf32> to vector<4x16x1xf32>
    %58 = vector.broadcast %57 : vector<4x16x1xf32> to vector<4x16x2xf32>
    %c0_66 = arith.constant 0 : index
    %c0_67 = arith.constant 0 : index
    %c28 = arith.constant 28 : index
    %59 = vector.load %arg3[%c0_66, %c0_67, %c28] : memref<4x16x32xf32, #tpu.memory_space<vmem>>, vector<4x16x2xf32>
    tpu.vector_store %arg3[%c0_66, %c0_67, %c28], %58 {strides = array<i32>} : memref<4x16x32xf32, #tpu.memory_space<vmem>>, vector<4x16x2xf32>,
    %c0_68 = arith.constant 0 : index
    %c0_69 = arith.constant 0 : index
    %c15 = arith.constant 15 : index
    %60 = vector.load %arg1[%c0_68, %c0_69, %c15] : memref<4x16x16xf32, #tpu.memory_space<vmem>>, vector<4x16x1xf32>
    %61 = vector.shape_cast %60 : vector<4x16x1xf32> to vector<4x16x1xf32>
    %62 = vector.broadcast %61 : vector<4x16x1xf32> to vector<4x16x2xf32>
    %c0_70 = arith.constant 0 : index
    %c0_71 = arith.constant 0 : index
    %c30 = arith.constant 30 : index
    %63 = vector.load %arg3[%c0_70, %c0_71, %c30] : memref<4x16x32xf32, #tpu.memory_space<vmem>>, vector<4x16x2xf32>
    tpu.vector_store %arg3[%c0_70, %c0_71, %c30], %62 {strides = array<i32>} : memref<4x16x32xf32, #tpu.memory_space<vmem>>, vector<4x16x2xf32>,
    %c0_72 = arith.constant 0 : index
    %c0_73 = arith.constant 0 : index
    %c0_74 = arith.constant 0 : index
    %64 = vector.load %arg3[%c0_72, %c0_73, %c0_74] : memref<4x16x32xf32, #tpu.memory_space<vmem>>, vector<4x1x32xf32>
    %65 = vector.shape_cast %64 : vector<4x1x32xf32> to vector<4x1x32xf32>
    %66 = vector.broadcast %65 : vector<4x1x32xf32> to vector<4x2x32xf32>
    %c0_75 = arith.constant 0 : index
    %c0_76 = arith.constant 0 : index
    %c0_77 = arith.constant 0 : index
    %67 = vector.load %arg2[%c0_75, %c0_76, %c0_77] : memref<4x32x32xf32, #tpu.memory_space<vmem>>, vector<4x2x32xf32>
    tpu.vector_store %arg2[%c0_75, %c0_76, %c0_77], %66 {strides = array<i32>} : memref<4x32x32xf32, #tpu.memory_space<vmem>>, vector<4x2x32xf32>,
    %c0_78 = arith.constant 0 : index
    %c1_79 = arith.constant 1 : index
    %c0_80 = arith.constant 0 : index
    %68 = vector.load %arg3[%c0_78, %c1_79, %c0_80] : memref<4x16x32xf32, #tpu.memory_space<vmem>>, vector<4x1x32xf32>
    %69 = vector.shape_cast %68 : vector<4x1x32xf32> to vector<4x1x32xf32>
    %70 = vector.broadcast %69 : vector<4x1x32xf32> to vector<4x2x32xf32>
    %c0_81 = arith.constant 0 : index
    %c2_82 = arith.constant 2 : index
    %c0_83 = arith.constant 0 : index
    %71 = vector.load %arg2[%c0_81, %c2_82, %c0_83] : memref<4x32x32xf32, #tpu.memory_space<vmem>>, vector<4x2x32xf32>
    tpu.vector_store %arg2[%c0_81, %c2_82, %c0_83], %70 {strides = array<i32>} : memref<4x32x32xf32, #tpu.memory_space<vmem>>, vector<4x2x32xf32>,
    %c0_84 = arith.constant 0 : index
    %c2_85 = arith.constant 2 : index
    %c0_86 = arith.constant 0 : index
    %72 = vector.load %arg3[%c0_84, %c2_85, %c0_86] : memref<4x16x32xf32, #tpu.memory_space<vmem>>, vector<4x1x32xf32>
    %73 = vector.shape_cast %72 : vector<4x1x32xf32> to vector<4x1x32xf32>
    %74 = vector.broadcast %73 : vector<4x1x32xf32> to vector<4x2x32xf32>
    %c0_87 = arith.constant 0 : index
    %c4_88 = arith.constant 4 : index
    %c0_89 = arith.constant 0 : index
    %75 = vector.load %arg2[%c0_87, %c4_88, %c0_89] : memref<4x32x32xf32, #tpu.memory_space<vmem>>, vector<4x2x32xf32>
    tpu.vector_store %arg2[%c0_87, %c4_88, %c0_89], %74 {strides = array<i32>} : memref<4x32x32xf32, #tpu.memory_space<vmem>>, vector<4x2x32xf32>,
    %c0_90 = arith.constant 0 : index
    %c3_91 = arith.constant 3 : index
    %c0_92 = arith.constant 0 : index
    %76 = vector.load %arg3[%c0_90, %c3_91, %c0_92] : memref<4x16x32xf32, #tpu.memory_space<vmem>>, vector<4x1x32xf32>
    %77 = vector.shape_cast %76 : vector<4x1x32xf32> to vector<4x1x32xf32>
    %78 = vector.broadcast %77 : vector<4x1x32xf32> to vector<4x2x32xf32>
    %c0_93 = arith.constant 0 : index
    %c6_94 = arith.constant 6 : index
    %c0_95 = arith.constant 0 : index
    %79 = vector.load %arg2[%c0_93, %c6_94, %c0_95] : memref<4x32x32xf32, #tpu.memory_space<vmem>>, vector<4x2x32xf32>
    tpu.vector_store %arg2[%c0_93, %c6_94, %c0_95], %78 {strides = array<i32>} : memref<4x32x32xf32, #tpu.memory_space<vmem>>, vector<4x2x32xf32>,
    %c0_96 = arith.constant 0 : index
    %c4_97 = arith.constant 4 : index
    %c0_98 = arith.constant 0 : index
    %80 = vector.load %arg3[%c0_96, %c4_97, %c0_98] : memref<4x16x32xf32, #tpu.memory_space<vmem>>, vector<4x1x32xf32>
    %81 = vector.shape_cast %80 : vector<4x1x32xf32> to vector<4x1x32xf32>
    %82 = vector.broadcast %81 : vector<4x1x32xf32> to vector<4x2x32xf32>
    %c0_99 = arith.constant 0 : index
    %c8_100 = arith.constant 8 : index
    %c0_101 = arith.constant 0 : index
    %83 = vector.load %arg2[%c0_99, %c8_100, %c0_101] : memref<4x32x32xf32, #tpu.memory_space<vmem>>, vector<4x2x32xf32>
    tpu.vector_store %arg2[%c0_99, %c8_100, %c0_101], %82 {strides = array<i32>} : memref<4x32x32xf32, #tpu.memory_space<vmem>>, vector<4x2x32xf32>,
    %c0_102 = arith.constant 0 : index
    %c5_103 = arith.constant 5 : index
    %c0_104 = arith.constant 0 : index
    %84 = vector.load %arg3[%c0_102, %c5_103, %c0_104] : memref<4x16x32xf32, #tpu.memory_space<vmem>>, vector<4x1x32xf32>
    %85 = vector.shape_cast %84 : vector<4x1x32xf32> to vector<4x1x32xf32>
    %86 = vector.broadcast %85 : vector<4x1x32xf32> to vector<4x2x32xf32>
    %c0_105 = arith.constant 0 : index
    %c10_106 = arith.constant 10 : index
    %c0_107 = arith.constant 0 : index
    %87 = vector.load %arg2[%c0_105, %c10_106, %c0_107] : memref<4x32x32xf32, #tpu.memory_space<vmem>>, vector<4x2x32xf32>
    tpu.vector_store %arg2[%c0_105, %c10_106, %c0_107], %86 {strides = array<i32>} : memref<4x32x32xf32, #tpu.memory_space<vmem>>, vector<4x2x32xf32>,
    %c0_108 = arith.constant 0 : index
    %c6_109 = arith.constant 6 : index
    %c0_110 = arith.constant 0 : index
    %88 = vector.load %arg3[%c0_108, %c6_109, %c0_110] : memref<4x16x32xf32, #tpu.memory_space<vmem>>, vector<4x1x32xf32>
    %89 = vector.shape_cast %88 : vector<4x1x32xf32> to vector<4x1x32xf32>
    %90 = vector.broadcast %89 : vector<4x1x32xf32> to vector<4x2x32xf32>
    %c0_111 = arith.constant 0 : index
    %c12_112 = arith.constant 12 : index
    %c0_113 = arith.constant 0 : index
    %91 = vector.load %arg2[%c0_111, %c12_112, %c0_113] : memref<4x32x32xf32, #tpu.memory_space<vmem>>, vector<4x2x32xf32>
    tpu.vector_store %arg2[%c0_111, %c12_112, %c0_113], %90 {strides = array<i32>} : memref<4x32x32xf32, #tpu.memory_space<vmem>>, vector<4x2x32xf32>,
    %c0_114 = arith.constant 0 : index
    %c7_115 = arith.constant 7 : index
    %c0_116 = arith.constant 0 : index
    %92 = vector.load %arg3[%c0_114, %c7_115, %c0_116] : memref<4x16x32xf32, #tpu.memory_space<vmem>>, vector<4x1x32xf32>
    %93 = vector.shape_cast %92 : vector<4x1x32xf32> to vector<4x1x32xf32>
    %94 = vector.broadcast %93 : vector<4x1x32xf32> to vector<4x2x32xf32>
    %c0_117 = arith.constant 0 : index
    %c14_118 = arith.constant 14 : index
    %c0_119 = arith.constant 0 : index
    %95 = vector.load %arg2[%c0_117, %c14_118, %c0_119] : memref<4x32x32xf32, #tpu.memory_space<vmem>>, vector<4x2x32xf32>
    tpu.vector_store %arg2[%c0_117, %c14_118, %c0_119], %94 {strides = array<i32>} : memref<4x32x32xf32, #tpu.memory_space<vmem>>, vector<4x2x32xf32>,
    %c0_120 = arith.constant 0 : index
    %c8_121 = arith.constant 8 : index
    %c0_122 = arith.constant 0 : index
    %96 = vector.load %arg3[%c0_120, %c8_121, %c0_122] : memref<4x16x32xf32, #tpu.memory_space<vmem>>, vector<4x1x32xf32>
    %97 = vector.shape_cast %96 : vector<4x1x32xf32> to vector<4x1x32xf32>
    %98 = vector.broadcast %97 : vector<4x1x32xf32> to vector<4x2x32xf32>
    %c0_123 = arith.constant 0 : index
    %c16_124 = arith.constant 16 : index
    %c0_125 = arith.constant 0 : index
    %99 = vector.load %arg2[%c0_123, %c16_124, %c0_125] : memref<4x32x32xf32, #tpu.memory_space<vmem>>, vector<4x2x32xf32>
    tpu.vector_store %arg2[%c0_123, %c16_124, %c0_125], %98 {strides = array<i32>} : memref<4x32x32xf32, #tpu.memory_space<vmem>>, vector<4x2x32xf32>,
    %c0_126 = arith.constant 0 : index
    %c9_127 = arith.constant 9 : index
    %c0_128 = arith.constant 0 : index
    %100 = vector.load %arg3[%c0_126, %c9_127, %c0_128] : memref<4x16x32xf32, #tpu.memory_space<vmem>>, vector<4x1x32xf32>
    %101 = vector.shape_cast %100 : vector<4x1x32xf32> to vector<4x1x32xf32>
    %102 = vector.broadcast %101 : vector<4x1x32xf32> to vector<4x2x32xf32>
    %c0_129 = arith.constant 0 : index
    %c18_130 = arith.constant 18 : index
    %c0_131 = arith.constant 0 : index
    %103 = vector.load %arg2[%c0_129, %c18_130, %c0_131] : memref<4x32x32xf32, #tpu.memory_space<vmem>>, vector<4x2x32xf32>
    tpu.vector_store %arg2[%c0_129, %c18_130, %c0_131], %102 {strides = array<i32>} : memref<4x32x32xf32, #tpu.memory_space<vmem>>, vector<4x2x32xf32>,
    %c0_132 = arith.constant 0 : index
    %c10_133 = arith.constant 10 : index
    %c0_134 = arith.constant 0 : index
    %104 = vector.load %arg3[%c0_132, %c10_133, %c0_134] : memref<4x16x32xf32, #tpu.memory_space<vmem>>, vector<4x1x32xf32>
    %105 = vector.shape_cast %104 : vector<4x1x32xf32> to vector<4x1x32xf32>
    %106 = vector.broadcast %105 : vector<4x1x32xf32> to vector<4x2x32xf32>
    %c0_135 = arith.constant 0 : index
    %c20_136 = arith.constant 20 : index
    %c0_137 = arith.constant 0 : index
    %107 = vector.load %arg2[%c0_135, %c20_136, %c0_137] : memref<4x32x32xf32, #tpu.memory_space<vmem>>, vector<4x2x32xf32>
    tpu.vector_store %arg2[%c0_135, %c20_136, %c0_137], %106 {strides = array<i32>} : memref<4x32x32xf32, #tpu.memory_space<vmem>>, vector<4x2x32xf32>,
    %c0_138 = arith.constant 0 : index
    %c11_139 = arith.constant 11 : index
    %c0_140 = arith.constant 0 : index
    %108 = vector.load %arg3[%c0_138, %c11_139, %c0_140] : memref<4x16x32xf32, #tpu.memory_space<vmem>>, vector<4x1x32xf32>
    %109 = vector.shape_cast %108 : vector<4x1x32xf32> to vector<4x1x32xf32>
    %110 = vector.broadcast %109 : vector<4x1x32xf32> to vector<4x2x32xf32>
    %c0_141 = arith.constant 0 : index
    %c22_142 = arith.constant 22 : index
    %c0_143 = arith.constant 0 : index
    %111 = vector.load %arg2[%c0_141, %c22_142, %c0_143] : memref<4x32x32xf32, #tpu.memory_space<vmem>>, vector<4x2x32xf32>
    tpu.vector_store %arg2[%c0_141, %c22_142, %c0_143], %110 {strides = array<i32>} : memref<4x32x32xf32, #tpu.memory_space<vmem>>, vector<4x2x32xf32>,
    %c0_144 = arith.constant 0 : index
    %c12_145 = arith.constant 12 : index
    %c0_146 = arith.constant 0 : index
    %112 = vector.load %arg3[%c0_144, %c12_145, %c0_146] : memref<4x16x32xf32, #tpu.memory_space<vmem>>, vector<4x1x32xf32>
    %113 = vector.shape_cast %112 : vector<4x1x32xf32> to vector<4x1x32xf32>
    %114 = vector.broadcast %113 : vector<4x1x32xf32> to vector<4x2x32xf32>
    %c0_147 = arith.constant 0 : index
    %c24_148 = arith.constant 24 : index
    %c0_149 = arith.constant 0 : index
    %115 = vector.load %arg2[%c0_147, %c24_148, %c0_149] : memref<4x32x32xf32, #tpu.memory_space<vmem>>, vector<4x2x32xf32>
    tpu.vector_store %arg2[%c0_147, %c24_148, %c0_149], %114 {strides = array<i32>} : memref<4x32x32xf32, #tpu.memory_space<vmem>>, vector<4x2x32xf32>,
    %c0_150 = arith.constant 0 : index
    %c13_151 = arith.constant 13 : index
    %c0_152 = arith.constant 0 : index
    %116 = vector.load %arg3[%c0_150, %c13_151, %c0_152] : memref<4x16x32xf32, #tpu.memory_space<vmem>>, vector<4x1x32xf32>
    %117 = vector.shape_cast %116 : vector<4x1x32xf32> to vector<4x1x32xf32>
    %118 = vector.broadcast %117 : vector<4x1x32xf32> to vector<4x2x32xf32>
    %c0_153 = arith.constant 0 : index
    %c26_154 = arith.constant 26 : index
    %c0_155 = arith.constant 0 : index
    %119 = vector.load %arg2[%c0_153, %c26_154, %c0_155] : memref<4x32x32xf32, #tpu.memory_space<vmem>>, vector<4x2x32xf32>
    tpu.vector_store %arg2[%c0_153, %c26_154, %c0_155], %118 {strides = array<i32>} : memref<4x32x32xf32, #tpu.memory_space<vmem>>, vector<4x2x32xf32>,
    %c0_156 = arith.constant 0 : index
    %c14_157 = arith.constant 14 : index
    %c0_158 = arith.constant 0 : index
    %120 = vector.load %arg3[%c0_156, %c14_157, %c0_158] : memref<4x16x32xf32, #tpu.memory_space<vmem>>, vector<4x1x32xf32>
    %121 = vector.shape_cast %120 : vector<4x1x32xf32> to vector<4x1x32xf32>
    %122 = vector.broadcast %121 : vector<4x1x32xf32> to vector<4x2x32xf32>
    %c0_159 = arith.constant 0 : index
    %c28_160 = arith.constant 28 : index
    %c0_161 = arith.constant 0 : index
    %123 = vector.load %arg2[%c0_159, %c28_160, %c0_161] : memref<4x32x32xf32, #tpu.memory_space<vmem>>, vector<4x2x32xf32>
    tpu.vector_store %arg2[%c0_159, %c28_160, %c0_161], %122 {strides = array<i32>} : memref<4x32x32xf32, #tpu.memory_space<vmem>>, vector<4x2x32xf32>,
    %c0_162 = arith.constant 0 : index
    %c15_163 = arith.constant 15 : index
    %c0_164 = arith.constant 0 : index
    %124 = vector.load %arg3[%c0_162, %c15_163, %c0_164] : memref<4x16x32xf32, #tpu.memory_space<vmem>>, vector<4x1x32xf32>
    %125 = vector.shape_cast %124 : vector<4x1x32xf32> to vector<4x1x32xf32>
    %126 = vector.broadcast %125 : vector<4x1x32xf32> to vector<4x2x32xf32>
    %c0_165 = arith.constant 0 : index
    %c30_166 = arith.constant 30 : index
    %c0_167 = arith.constant 0 : index
    %127 = vector.load %arg2[%c0_165, %c30_166, %c0_167] : memref<4x32x32xf32, #tpu.memory_space<vmem>>, vector<4x2x32xf32>
    tpu.vector_store %arg2[%c0_165, %c30_166, %c0_167], %126 {strides = array<i32>} : memref<4x32x32xf32, #tpu.memory_space<vmem>>, vector<4x2x32xf32>,
    return
  }
  func.func @transform_0(%arg0: i32) -> (i32, i32, i32) {
    %c0_i32 = arith.constant 0 : i32
    %c0_i32_0 = arith.constant 0 : i32
    %c0_i32_1 = arith.constant 0 : i32
    return %arg0, %c0_i32, %c0_i32_0 : i32, i32, i32
  }
  func.func @transform_1(%arg0: i32) -> (i32, i32, i32) {
    %c0_i32 = arith.constant 0 : i32
    %c0_i32_0 = arith.constant 0 : i32
    %c0_i32_1 = arith.constant 0 : i32
    return %arg0, %c0_i32, %c0_i32_0 : i32, i32, i32
  }
}

</mosaic_0001>

<bundles_post_ra>
// kernel: tpu_custom_call.1
= control target key start
LH: loop header
LB: loop body
LE: loop exit
PB: predicated region body
PF: predicated region fallthrough
CT: control target
= control target key end

     0   :  { %6 = vsyncpa [#allocation4], 0  ;;  %s2209_s0 = inlined_call_operand.hbm [shape: f32[8,16,16], index: 0, kind: input, shape index: {}]   ;;  %s2210_s1 = inlined_call_operand.hbm [shape: f32[8,32,32], index: 1, kind: output, shape index: {}]  }
   0x1   :  { %8 = vsyncpa [#allocation4 + $0x1], 0 }
   0x2   :  { %9 = vsyncpa [#allocation5], 0 }
   0x3   :  { %11 = vsyncpa [#allocation5 + $0x1], 0  ;;  %s1661_s6 = smov 0   ;;  %s1663_s7 = smov 0  }
   0x4   :  { %s1665_s8 = smov 0   ;;  %s1667_s9 = smov 0  }
   0x5 LB: > { %s1682_s10 = sadd.s32 4294967295, %s1629_s9   ;;  %s1335_s11 = sadd.s32 4294967294, %s1629_s9   ;;  %s1629_s9 = sphi %s1667_s9, %s2220_s9   ;;  %s1625_s8 = sphi %s1665_s8, %s2219_s8   ;;  %s1621_s7 = sphi %s1663_s7, %s2218_s7   ;;  %s1617_s6 = sphi %s1661_s6, %s2217_s6  }
   0x6   : > { %s1686_s12 = sadd.s32 1, %s1629_s9   ;;  %s24_s13 = sadd.s32 1, %s1625_s8 }
   0x7   : > { %s21_s14 = ssub.s32 %s1629_s9, %s1686_s12  ;;  %p31_p0 = scmp.ne.s32.totalorder %s1625_s8, %s1621_s7 }
   0x8   : > { %p22_p1 = scmp.eq.s32.totalorder %s21_s14, 0  ;;  %p32_p2 = scmp.eq.s32.totalorder %s1629_s9, 0 }
   0x9   : > { %p37_p3 = scmp.ne.s32.totalorder %s1621_s7, %s1617_s6  ;;  %p38_p4 = scmp.eq.s32.totalorder %s1682_s10, 0 }
   0xa   : > { %s1698_s15 = scalar_select %p22_p1, %s1625_s8, %s24_s13  }
   0xb   : > { %p1700_p5 = por %p32_p2, %p31_p0  ;;  %p1704_p6 = por %p38_p4, %p37_p3 }
   0xc   : > { %p61_p7 = scmp.eq.s32.totalorder %s1682_s10, 1  ;;  %p67_p8 = scmp.eq.s32.totalorder %s1335_s11, 1 }
   0xd   : > { %p1367_p10 = scmp.lt.s32.totalorder %s1629_s9, 2  ;;  %s87_s20 = sand.u32 1, %s1625_s8  }
   0xe   : > { %p1711_p11 = por %p61_p7, %p31_p0  ;;  %p1715_p12 = por %p67_p8, %p37_p3 }
   0xf   : > { %s1352_s21 = sshll.u32 %s1629_s9, 6  ;;  %s1338_s22 = sshll.u32 %s87_s20, 6 }
  0x10   : > { %s97_s25 = scalar_lea.hbm %s2209_s0, %s1352_s21  ;;  %s91_s27 = scalar_lea.vmem [#allocation3], %s1338_s22 }
  0x11   : > { %s98_s26 = sshll.u32 %s97_s25, 4  ;;  %s100_s28 = sshll.u32 %s91_s27, 4  ;;  %s99_s26 = int_to_ptr.hbm [resolvable:$true] %s98_s26  ;;  %s101_s28 = int_to_ptr.vmem [resolvable:$true] %s100_s28 }
  0x12   : > { %p1726_p13 = pnand %p1367_p10, %p1700_p5  ;;  %p1342_p0 = scmp.ge.s32.totalorder %s1629_s9, 1 }
  0x13   : > { %p108_p1 = scmp.lt.s32.totalorder %s1629_s9, 3  ;;  %s88_s30 = scalar_lea.sflag [#allocation4], %s87_s20 }
  0x14   : > { %s1533_s2 = sshra.s32 %s99_s26, 4  ;;  %p1537_p3 = pneg %p1726_p13  ;;  %s1534_s2 = int_to_ptr.hbm [resolvable:$true] %s1533_s2 }
  0x15   : > { %s1535_s3 = scalar_lea.hbm %s1534_s2, 64  ;;  %s1540_s11 = scalar_lea.hbm %s2209_s0, 128 }
  0x16   : > { %p1536_p2 = scmp.ne.s32.totalorder %s1534_s2, %s1535_s3  ;;  %p1541_p5 = scmp.lt.s32.totalorder %s1534_s2, %s2209_s0 }
  0x17   : > { %p1542_p8 = scmp.lt.s32.totalorder %s1540_s11, %s1535_s3 }
  0x18   : > { %p1538_p4 = pnand %p1537_p3, %p1536_p2 }
  0x19   : > { %p1543_p10 = por %p1542_p8, %p1541_p5 }
  0x1a   : > { %p1539_p7 = pneg %p1538_p4 }
  0x1c   : > { %p1544_p9 = pnand %p1543_p10, %p1539_p7 }
  0x1e   : > { %1547 = shalt.err (!%p1544_p9)
}
  0x1f   : > { %s1631_s16 = smov 128   ;;  %s1632_s20 = smov 8  }
  0x20   : > { %1362 = dma.hbm_to_vmem [thread:$0]  (!%p1726_p13), %s99_s26, 1024, %s101_s28, %s88_s30, %s1631_s16, %s1631_s16, %s1632_s20  }
  0x21   : > { %p109_p2 = pnand %p1342_p0, %p108_p1 }
  0x22   : > { %s1747_s21 = sand.u32 (!%p109_p2), 1, %s1621_s7  }
  0x23   : > { %112 = sbr.rel (%p109_p2) target bundleno = 578 (0x242), region = 24  ;;  %s1343_s22 = sshll.u32 (!%p109_p2), %s1747_s21, 6 }
  0x24   : > { %s115_s23 = scalar_lea.sflag (!%p109_p2), [#allocation4], %s1747_s21  ;;  %s1751_s24 = scalar_lea.vmem (!%p109_p2), [#allocation3], %s1343_s22 }
  0x28   : > { %1608 = dma.done.wait (%p1704_p6), %s115_s23, 1024  }
  0x29   : > { %1610 = vsyncadd (%p1704_p6), %s115_s23, 4294966272  ;;  %v1633_v0 = vmov 0   ;;  %v1758_v1 = vld [vmem:[%s1751_s24 + $0x10] sm:$0xff]  ;;  %v1761_v2 = vld [vmem:[%s1751_s24 + $0x20] sm:$0xff]  ;;  %v1634_v7 = vmov 1   ;;  %v1635_v8 = vmov 2  }
  0x2a   : > { %1422 = vset.pattern.permute.xlu1 %v1633_v0  ;;  %1423 = vset.pattern.permute.xlu2 %v1633_v0  ;;  %v1766_v3 = vld [vmem:[%s1751_s24] sm:$0xff]  ;;  %v1770_v4 = vld [vmem:[%s1751_s24 + $0x18] sm:$0xff]  ;;  %v1773_v5 = vld [vmem:[%s1751_s24 + $0x28] sm:$0xff]  ;;  %v1636_v9 = vmov 3   ;;  %vm188_vm0 = vcmask 15360   ;;  %v1637_v13 = vmov 4  }
  0x2b   : > { %1421 = vset.pattern.permute.xlu0 %v1633_v0  ;;  %160 = vperm.xlu1 %1422, %v1758_v1   ;;  %v1778_v6 = vld [vmem:[%s1751_s24 + $0x38] sm:$0xff]  ;;  %v1797_v10 = vld [vmem:[%s1751_s24 + $0x8] sm:$0xff]  ;;  %v1803_v11 = vld [vmem:[%s1751_s24 + $0x30] sm:$0xff]  ;;  %vm245_vm1 = vcmask 31760   ;;  %v1638_v19 = vmov 5   ;;  %vm302_vm2 = vcmask 48160  }
  0x2c   : > { %170 = vperm.xlu2 %1423, %v1761_v2   ;;  %150 = vperm.xlu0 %1421, %v1766_v3   ;;  %v1639_v26 = vmov 6   ;;  %vm359_vm3 = vcmask 64560   ;;  %v1640_v33 = vmov 7   ;;  %vm416_vm4 = vcmask 80960   ;;  %s1344_s17 = sshll.u32 %s1747_s21, 7  ;;  %s1354_s26 = sshll.u32 %s1682_s10, 7 }
  0x2d   : > { %v1641_v40 = vmov 8   ;;  %vm473_vm5 = vcmask 97360   ;;  %v1642_v49 = vmov 9   ;;  %vm530_vm6 = vcmask 113760   ;;  %s2029_s25 = scalar_lea.vmem [#allocation6], %s1344_s17  ;;  %s2124_s29 = scalar_lea.hbm %s2210_s1, %s1354_s26 }
  0x2e   : > { %v1643_v59 = vmov 10   ;;  %vm587_vm7 = vcmask 130160   ;;  %vm644_vm8 = vcmask 146560   ;;  %vm701_vm9 = vcmask 162960   ;;  %s1259_s30 = sshll.u32 %s2029_s25, 4  ;;  %s1261_s2 = sshll.u32 %s2124_s29, 4  ;;  %s1260_s30 = int_to_ptr.vmem [resolvable:$true] %s1259_s30  ;;  %s1262_s2 = int_to_ptr.hbm [resolvable:$true] %s1261_s2 }
  0x2f   : > { %vm758_vm10 = vcmask 179360   ;;  %vm815_vm11 = vcmask 195760   ;;  %vm872_vm12 = vcmask 212160   ;;  %vm929_vm13 = vcmask 228560   ;;  %s1246_s10 = scalar_lea.sflag [#allocation5], %s1747_s21  ;;  %s1577_s3 = sshra.s32 %s1262_s2, 4  ;;  %s1578_s3 = int_to_ptr.hbm [resolvable:$true] %s1577_s3 }
  0x30   : > { %vm986_vm14 = vcmask 244960   ;;  %vm1043_vm15 = vcmask 261360   ;;  %s1579_s4 = scalar_lea.hbm %s1578_s3, 128  ;;  %s1583_s13 = scalar_lea.hbm %s2210_s1, 256 }
  0x31   : > { %p1580_p6 = scmp.ne.s32.totalorder %s1578_s3, %s1579_s4  ;;  %p1584_p0 = scmp.lt.s32.totalorder %s1578_s3, %s2210_s1 }
  0x32   : > { %p1585_p1 = scmp.lt.s32.totalorder %s1583_s13, %s1579_s4 }
  0x33   : > { %165 = vperm.xlu1 %1422, %v1770_v4   ;;  %p1581_p9 = pnand %p1580_p6, %p1711_p11 }
  0x34   : > { %175 = vperm.xlu2 %1423, %v1773_v5   ;;  %155 = vperm.xlu0 %1421, %v1797_v10   ;;  %p1586_p3 = por %p1585_p1, %p1584_p0 }
  0x35   : > { %p1582_p13 = pneg %p1581_p9 }
  0x37   : > { %p1587_p4 = pnand %p1586_p3, %p1582_p13 }
  0x3b   : > { %185 = vperm.xlu1 %1422, %v1778_v6  }
  0x3c   : > { %1424 = vset.pattern.permute.xlu2 %v1634_v7  ;;  %180 = vperm.xlu0 %1421, %v1803_v11  }
  0x3d   : > { %207 = vperm.xlu2 %1424, %v1766_v3  }
  0x43   : > { %1426 = vset.pattern.permute.xlu1 %v1634_v7 }
  0x44   : > { %217 = vperm.xlu1 %1426, %v1758_v1   ;;  %1425 = vset.pattern.permute.xlu0 %v1634_v7 }
  0x45   : > { %222 = vperm.xlu2 %1424, %v1770_v4   ;;  %212 = vperm.xlu0 %1425, %v1797_v10  }
  0x4c   : > { %227 = vperm.xlu1 %1426, %v1761_v2  }
  0x4d   : > { %232 = vperm.xlu2 %1424, %v1773_v5   ;;  %237 = vperm.xlu0 %1425, %v1803_v11  }
  0x54   : > { %242 = vperm.xlu1 %1426, %v1778_v6  }
  0x55   : > { %1427 = vset.pattern.permute.xlu2 %v1635_v8  ;;  %1428 = vset.pattern.permute.xlu0 %v1635_v8 }
  0x56   : > { %264 = vperm.xlu2 %1427, %v1766_v3   ;;  %269 = vperm.xlu0 %1428, %v1797_v10  }
  0x5c   : > { %1429 = vset.pattern.permute.xlu1 %v1635_v8 }
  0x5d   : > { %274 = vperm.xlu1 %1429, %v1758_v1  }
  0x5e   : > { %279 = vperm.xlu2 %1427, %v1770_v4   ;;  %294 = vperm.xlu0 %1428, %v1803_v11  }
  0x65   : > { %284 = vperm.xlu1 %1429, %v1761_v2  }
  0x66   : > { %289 = vperm.xlu2 %1427, %v1773_v5   ;;  %1431 = vset.pattern.permute.xlu0 %v1636_v9 }
  0x67   : > { %326 = vperm.xlu0 %1431, %v1797_v10  }
  0x6d   : > { %299 = vperm.xlu1 %1429, %v1778_v6  }
  0x6e   : > { %1430 = vset.pattern.permute.xlu2 %v1636_v9 }
  0x6f   : > { %321 = vperm.xlu2 %1430, %v1766_v3   ;;  %351 = vperm.xlu0 %1431, %v1803_v11  }
  0x75   : > { %1432 = vset.pattern.permute.xlu1 %v1636_v9  ;;  %v1644_v9 = vmov 11  }
  0x76   : > { %331 = vperm.xlu1 %1432, %v1758_v1  }
  0x77   : > { %336 = vperm.xlu2 %1430, %v1770_v4   ;;  %1434 = vset.pattern.permute.xlu0 %v1637_v13 }
  0x78   : > { %383 = vperm.xlu0 %1434, %v1797_v10  }
  0x7e   : > { %341 = vperm.xlu1 %1432, %v1761_v2  }
  0x7f   : > { %346 = vperm.xlu2 %1430, %v1773_v5  }
  0x80   : > { %408 = vperm.xlu0 %1434, %v1803_v11  }
  0x86   : > { %v171_v12 = vpop.permute.xlu2 %170  ;;  %356 = vperm.xlu1 %1432, %v1778_v6  }
  0x87   : > { %1433 = vset.pattern.permute.xlu2 %v1637_v13  ;;  %193 = vst.msk [vmem:[#allocation2 + $0x20] sm:$0xff] %vm188_vm0, %v171_v12 }
  0x88   : > { %378 = vperm.xlu2 %1433, %v1766_v3   ;;  %1437 = vset.pattern.permute.xlu0 %v1638_v19 }
  0x89   : > { %440 = vperm.xlu0 %1437, %v1797_v10  }
  0x8e   : > { %v176_v14 = vpop.permute.xlu2 %175  ;;  %1435 = vset.pattern.permute.xlu1 %v1637_v13 }
  0x8f   : > { %194 = vst.msk [vmem:[#allocation2 + $0x28] sm:$0xff] %vm188_vm0, %v176_v14  ;;  %388 = vperm.xlu1 %1435, %v1758_v1  }
  0x90   : > { %393 = vperm.xlu2 %1433, %v1770_v4  }
  0x91   : > { %465 = vperm.xlu0 %1437, %v1803_v11  }
  0x97   : > { %v208_v15 = vpop.permute.xlu2 %207  ;;  %398 = vperm.xlu1 %1435, %v1761_v2  }
  0x98   : > { %403 = vperm.xlu2 %1433, %v1773_v5  }
  0x99   : > { %1440 = vset.pattern.permute.xlu0 %v1639_v26 }
  0x9a   : > { %497 = vperm.xlu0 %1440, %v1797_v10  }
  0x9d   : > { %v161_v16 = vpop.permute.xlu1 %160 }
  0x9e   : > { %191 = vst.msk [vmem:[#allocation2 + $0x10] sm:$0xff] %vm188_vm0, %v161_v16  ;;  %v151_v18 = vpop.permute.xlu0 %150 }
  0x9f   : > { %v223_v17 = vpop.permute.xlu2 %222  ;;  %413 = vperm.xlu1 %1435, %v1778_v6   ;;  %189 = vst.msk [vmem:[#allocation2] sm:$0xff] %vm188_vm0, %v151_v18 }
  0xa0   : > { %1436 = vset.pattern.permute.xlu2 %v1638_v19  ;;  %246 = vst.msk [vmem:[#allocation2] sm:$0xff] %vm245_vm1, %v208_v15 }
  0xa1   : > { %435 = vperm.xlu2 %1436, %v1766_v3  }
  0xa2   : > { %522 = vperm.xlu0 %1440, %v1803_v11  }
  0xa5   : > { %v166_v20 = vpop.permute.xlu1 %165 }
  0xa6   : > { %192 = vst.msk [vmem:[#allocation2 + $0x18] sm:$0xff] %vm188_vm0, %v166_v20  ;;  %v156_v41 = vpop.permute.xlu0 %155 }
  0xa7   : > { %v233_v21 = vpop.permute.xlu2 %232  ;;  %1438 = vset.pattern.permute.xlu1 %v1638_v19  ;;  %249 = vst.msk [vmem:[#allocation2 + $0x18] sm:$0xff] %vm245_vm1, %v223_v17  ;;  %v1645_v19 = vmov 12  }
  0xa8   : > { %445 = vperm.xlu1 %1438, %v1758_v1   ;;  %251 = vst.msk [vmem:[#allocation2 + $0x28] sm:$0xff] %vm245_vm1, %v233_v21 }
  0xa9   : > { %450 = vperm.xlu2 %1436, %v1770_v4   ;;  %190 = vst.msk [vmem:[#allocation2 + $0x8] sm:$0xff] %vm188_vm0, %v156_v41 }
  0xaa   : > { %1443 = vset.pattern.permute.xlu0 %v1640_v33 }
  0xab   : > { %554 = vperm.xlu0 %1443, %v1797_v10  }
  0xad   : > { %v186_v22 = vpop.permute.xlu1 %185 }
  0xae   : > { %196 = vst.msk [vmem:[#allocation2 + $0x38] sm:$0xff] %vm188_vm0, %v186_v22  ;;  %v181_v44 = vpop.permute.xlu0 %180 }
  0xaf   : > { %195 = vst.msk [vmem:[#allocation2 + $0x30] sm:$0xff] %vm188_vm0, %v181_v44  ;;  %v1648_v44 = vmov 15   ;;  %vm1060_vm0 = vcmask 254976  }
  0xb0   : > { %v265_v23 = vpop.permute.xlu2 %264  ;;  %455 = vperm.xlu1 %1438, %v1761_v2  }
  0xb1   : > { %303 = vst.msk [vmem:[#allocation2] sm:$0xff] %vm302_vm2, %v265_v23  ;;  %460 = vperm.xlu2 %1436, %v1773_v5  }
  0xb3   : > { %579 = vperm.xlu0 %1443, %v1803_v11  }
  0xb6   : > { %v218_v24 = vpop.permute.xlu1 %217 }
  0xb7   : > { %248 = vst.msk [vmem:[#allocation2 + $0x10] sm:$0xff] %vm245_vm1, %v218_v24  ;;  %v213_v50 = vpop.permute.xlu0 %212 }
  0xb8   : > { %v280_v25 = vpop.permute.xlu2 %279  ;;  %470 = vperm.xlu1 %1438, %v1778_v6   ;;  %247 = vst.msk [vmem:[#allocation2 + $0x8] sm:$0xff] %vm245_vm1, %v213_v50 }
  0xb9   : > { %306 = vst.msk [vmem:[#allocation2 + $0x18] sm:$0xff] %vm302_vm2, %v280_v25  ;;  %1439 = vset.pattern.permute.xlu2 %v1639_v26 }
  0xba   : > { %492 = vperm.xlu2 %1439, %v1766_v3  }
  0xbb   : > { %1446 = vset.pattern.permute.xlu0 %v1641_v40 }
  0xbc   : > { %611 = vperm.xlu0 %1446, %v1797_v10  }
  0xbe   : > { %v228_v27 = vpop.permute.xlu1 %227 }
  0xbf   : > { %250 = vst.msk [vmem:[#allocation2 + $0x20] sm:$0xff] %vm245_vm1, %v228_v27  ;;  %v238_v53 = vpop.permute.xlu0 %237 }
  0xc0   : > { %v290_v28 = vpop.permute.xlu2 %289  ;;  %1441 = vset.pattern.permute.xlu1 %v1639_v26  ;;  %252 = vst.msk [vmem:[#allocation2 + $0x30] sm:$0xff] %vm245_vm1, %v238_v53  ;;  %v1646_v26 = vmov 13  }
  0xc1   : > { %308 = vst.msk [vmem:[#allocation2 + $0x28] sm:$0xff] %vm302_vm2, %v290_v28  ;;  %502 = vperm.xlu1 %1441, %v1758_v1  }
  0xc2   : > { %507 = vperm.xlu2 %1439, %v1770_v4  }
  0xc4   : > { %636 = vperm.xlu0 %1446, %v1803_v11  }
  0xc6   : > { %v243_v29 = vpop.permute.xlu1 %242 }
  0xc7   : > { %253 = vst.msk [vmem:[#allocation2 + $0x38] sm:$0xff] %vm245_vm1, %v243_v29 }
  0xc8   : > { %v270_v56 = vpop.permute.xlu0 %269 }
  0xc9   : > { %v322_v30 = vpop.permute.xlu2 %321  ;;  %512 = vperm.xlu1 %1441, %v1761_v2   ;;  %304 = vst.msk [vmem:[#allocation2 + $0x8] sm:$0xff] %vm302_vm2, %v270_v56 }
  0xca   : > { %360 = vst.msk [vmem:[#allocation2] sm:$0xff] %vm359_vm3, %v322_v30  ;;  %517 = vperm.xlu2 %1439, %v1773_v5  }
  0xcc   : > { %1449 = vset.pattern.permute.xlu0 %v1642_v49 }
  0xcd   : > { %668 = vperm.xlu0 %1449, %v1797_v10  }
  0xcf   : > { %v275_v31 = vpop.permute.xlu1 %274 }
  0xd0   : > { %305 = vst.msk [vmem:[#allocation2 + $0x10] sm:$0xff] %vm302_vm2, %v275_v31  ;;  %v295_v60 = vpop.permute.xlu0 %294 }
  0xd1   : > { %v337_v32 = vpop.permute.xlu2 %336  ;;  %527 = vperm.xlu1 %1441, %v1778_v6   ;;  %309 = vst.msk [vmem:[#allocation2 + $0x30] sm:$0xff] %vm302_vm2, %v295_v60 }
  0xd2   : > { %363 = vst.msk [vmem:[#allocation2 + $0x18] sm:$0xff] %vm359_vm3, %v337_v32  ;;  %1442 = vset.pattern.permute.xlu2 %v1640_v33 }
  0xd3   : > { %549 = vperm.xlu2 %1442, %v1766_v3  }
  0xd5   : > { %693 = vperm.xlu0 %1449, %v1803_v11  }
  0xd7   : > { %v285_v34 = vpop.permute.xlu1 %284 }
  0xd8   : > { %307 = vst.msk [vmem:[#allocation2 + $0x20] sm:$0xff] %vm302_vm2, %v285_v34  ;;  %v1647_v34 = vmov 14  }
  0xd9   : > { %v347_v35 = vpop.permute.xlu2 %346  ;;  %1444 = vset.pattern.permute.xlu1 %v1640_v33  ;;  %v327_v63 = vpop.permute.xlu0 %326 }
  0xda   : > { %365 = vst.msk [vmem:[#allocation2 + $0x28] sm:$0xff] %vm359_vm3, %v347_v35  ;;  %559 = vperm.xlu1 %1444, %v1758_v1  }
  0xdb   : > { %564 = vperm.xlu2 %1442, %v1770_v4   ;;  %361 = vst.msk [vmem:[#allocation2 + $0x8] sm:$0xff] %vm359_vm3, %v327_v63 }
  0xdd   : > { %1452 = vset.pattern.permute.xlu0 %v1643_v59 }
  0xde   : > { %725 = vperm.xlu0 %1452, %v1797_v10  }
  0xdf   : > { %v300_v36 = vpop.permute.xlu1 %299 }
  0xe0   : > { %310 = vst.msk [vmem:[#allocation2 + $0x38] sm:$0xff] %vm302_vm2, %v300_v36 }
  0xe1   : > { %v352_v8 = vpop.permute.xlu0 %351 }
  0xe2   : > { %v379_v37 = vpop.permute.xlu2 %378  ;;  %569 = vperm.xlu1 %1444, %v1761_v2   ;;  %366 = vst.msk [vmem:[#allocation2 + $0x30] sm:$0xff] %vm359_vm3, %v352_v8 }
  0xe3   : > { %417 = vst.msk [vmem:[#allocation2] sm:$0xff] %vm416_vm4, %v379_v37  ;;  %574 = vperm.xlu2 %1442, %v1773_v5  }
  0xe6   : > { %750 = vperm.xlu0 %1452, %v1803_v11  }
  0xe8   : > { %v332_v38 = vpop.permute.xlu1 %331 }
  0xe9   : > { %362 = vst.msk [vmem:[#allocation2 + $0x10] sm:$0xff] %vm359_vm3, %v332_v38 }
  0xea   : > { %v394_v39 = vpop.permute.xlu2 %393  ;;  %584 = vperm.xlu1 %1444, %v1778_v6   ;;  %v384_v14 = vpop.permute.xlu0 %383 }
  0xeb   : > { %420 = vst.msk [vmem:[#allocation2 + $0x18] sm:$0xff] %vm416_vm4, %v394_v39  ;;  %1445 = vset.pattern.permute.xlu2 %v1641_v40 }
  0xec   : > { %606 = vperm.xlu2 %1445, %v1766_v3   ;;  %418 = vst.msk [vmem:[#allocation2 + $0x8] sm:$0xff] %vm416_vm4, %v384_v14 }
  0xee   : > { %1455 = vset.pattern.permute.xlu0 %v1644_v9 }
  0xef   : > { %782 = vperm.xlu0 %1455, %v1797_v10  }
  0xf0   : > { %v342_v42 = vpop.permute.xlu1 %341 }
  0xf1   : > { %364 = vst.msk [vmem:[#allocation2 + $0x20] sm:$0xff] %vm359_vm3, %v342_v42 }
  0xf2   : > { %v404_v43 = vpop.permute.xlu2 %403  ;;  %1447 = vset.pattern.permute.xlu1 %v1641_v40  ;;  %v409_v17 = vpop.permute.xlu0 %408 }
  0xf3   : > { %422 = vst.msk [vmem:[#allocation2 + $0x28] sm:$0xff] %vm416_vm4, %v404_v43  ;;  %616 = vperm.xlu1 %1447, %v1758_v1  }
  0xf4   : > { %621 = vperm.xlu2 %1445, %v1770_v4   ;;  %423 = vst.msk [vmem:[#allocation2 + $0x30] sm:$0xff] %vm416_vm4, %v409_v17 }
  0xf7   : > { %807 = vperm.xlu0 %1455, %v1803_v11  }
  0xf8   : > { %v357_v45 = vpop.permute.xlu1 %356 }
  0xf9   : > { %367 = vst.msk [vmem:[#allocation2 + $0x38] sm:$0xff] %vm359_vm3, %v357_v45 }
  0xfb   : > { %v436_v46 = vpop.permute.xlu2 %435  ;;  %626 = vperm.xlu1 %1447, %v1761_v2   ;;  %v441_v21 = vpop.permute.xlu0 %440 }
  0xfc   : > { %474 = vst.msk [vmem:[#allocation2] sm:$0xff] %vm473_vm5, %v436_v46  ;;  %631 = vperm.xlu2 %1445, %v1773_v5  }
  0xfd   : > { %475 = vst.msk [vmem:[#allocation2 + $0x8] sm:$0xff] %vm473_vm5, %v441_v21 }
  0xff   : > { %1458 = vset.pattern.permute.xlu0 %v1645_v19 }
 0x100   : > { %839 = vperm.xlu0 %1458, %v1797_v10  }
 0x101   : > { %v389_v47 = vpop.permute.xlu1 %388 }
 0x102   : > { %419 = vst.msk [vmem:[#allocation2 + $0x10] sm:$0xff] %vm416_vm4, %v389_v47 }
 0x103   : > { %v451_v48 = vpop.permute.xlu2 %450  ;;  %641 = vperm.xlu1 %1447, %v1778_v6   ;;  %v466_v24 = vpop.permute.xlu0 %465 }
 0x104   : > { %477 = vst.msk [vmem:[#allocation2 + $0x18] sm:$0xff] %vm473_vm5, %v451_v48  ;;  %1448 = vset.pattern.permute.xlu2 %v1642_v49 }
 0x105   : > { %663 = vperm.xlu2 %1448, %v1766_v3   ;;  %480 = vst.msk [vmem:[#allocation2 + $0x30] sm:$0xff] %vm473_vm5, %v466_v24 }
 0x108   : > { %864 = vperm.xlu0 %1458, %v1803_v11  }
 0x109   : > { %v399_v51 = vpop.permute.xlu1 %398 }
 0x10a   : > { %421 = vst.msk [vmem:[#allocation2 + $0x20] sm:$0xff] %vm416_vm4, %v399_v51 }
 0x10b   : > { %v461_v52 = vpop.permute.xlu2 %460  ;;  %1450 = vset.pattern.permute.xlu1 %v1642_v49 }
 0x10c   : > { %479 = vst.msk [vmem:[#allocation2 + $0x28] sm:$0xff] %vm473_vm5, %v461_v52  ;;  %673 = vperm.xlu1 %1450, %v1758_v1   ;;  %v498_v28 = vpop.permute.xlu0 %497 }
 0x10d   : > { %678 = vperm.xlu2 %1448, %v1770_v4   ;;  %532 = vst.msk [vmem:[#allocation2 + $0x8] sm:$0xff] %vm530_vm6, %v498_v28 }
 0x110   : > { %1461 = vset.pattern.permute.xlu0 %v1646_v26 }
 0x111   : > { %v414_v54 = vpop.permute.xlu1 %413  ;;  %896 = vperm.xlu0 %1461, %v1797_v10  }
 0x112   : > { %424 = vst.msk [vmem:[#allocation2 + $0x38] sm:$0xff] %vm416_vm4, %v414_v54 }
 0x114   : > { %v493_v55 = vpop.permute.xlu2 %492  ;;  %683 = vperm.xlu1 %1450, %v1761_v2   ;;  %v523_v31 = vpop.permute.xlu0 %522 }
 0x115   : > { %531 = vst.msk [vmem:[#allocation2] sm:$0xff] %vm530_vm6, %v493_v55  ;;  %688 = vperm.xlu2 %1448, %v1773_v5  }
 0x116   : > { %537 = vst.msk [vmem:[#allocation2 + $0x30] sm:$0xff] %vm530_vm6, %v523_v31 }
 0x119   : > { %921 = vperm.xlu0 %1461, %v1803_v11  }
 0x11a   : > { %v446_v57 = vpop.permute.xlu1 %445 }
 0x11b   : > { %476 = vst.msk [vmem:[#allocation2 + $0x10] sm:$0xff] %vm473_vm5, %v446_v57 }
 0x11c   : > { %v508_v58 = vpop.permute.xlu2 %507  ;;  %698 = vperm.xlu1 %1450, %v1778_v6  }
 0x11d   : > { %534 = vst.msk [vmem:[#allocation2 + $0x18] sm:$0xff] %vm530_vm6, %v508_v58  ;;  %1451 = vset.pattern.permute.xlu2 %v1643_v59  ;;  %v555_v35 = vpop.permute.xlu0 %554 }
 0x11e   : > { %720 = vperm.xlu2 %1451, %v1766_v3   ;;  %589 = vst.msk [vmem:[#allocation2 + $0x8] sm:$0xff] %vm587_vm7, %v555_v35 }
 0x121   : > { %1464 = vset.pattern.permute.xlu0 %v1647_v34 }
 0x122   : > { %v456_v61 = vpop.permute.xlu1 %455  ;;  %953 = vperm.xlu0 %1464, %v1797_v10  }
 0x123   : > { %478 = vst.msk [vmem:[#allocation2 + $0x20] sm:$0xff] %vm473_vm5, %v456_v61 }
 0x124   : > { %v518_v62 = vpop.permute.xlu2 %517  ;;  %1453 = vset.pattern.permute.xlu1 %v1643_v59 }
 0x125   : > { %536 = vst.msk [vmem:[#allocation2 + $0x28] sm:$0xff] %vm530_vm6, %v518_v62  ;;  %730 = vperm.xlu1 %1453, %v1758_v1   ;;  %v580_v38 = vpop.permute.xlu0 %579 }
 0x126   : > { %735 = vperm.xlu2 %1451, %v1770_v4   ;;  %594 = vst.msk [vmem:[#allocation2 + $0x30] sm:$0xff] %vm587_vm7, %v580_v38 }
 0x12a   : > { %v471_v0 = vpop.permute.xlu1 %470  ;;  %978 = vperm.xlu0 %1464, %v1803_v11  }
 0x12b   : > { %481 = vst.msk [vmem:[#allocation2 + $0x38] sm:$0xff] %vm473_vm5, %v471_v0 }
 0x12d   : > { %v550_v7 = vpop.permute.xlu2 %549  ;;  %740 = vperm.xlu1 %1453, %v1761_v2  }
 0x12e   : > { %588 = vst.msk [vmem:[#allocation2] sm:$0xff] %vm587_vm7, %v550_v7  ;;  %745 = vperm.xlu2 %1451, %v1773_v5   ;;  %v612_v41 = vpop.permute.xlu0 %611 }
 0x12f   : > { %646 = vst.msk [vmem:[#allocation2 + $0x8] sm:$0xff] %vm644_vm8, %v612_v41 }
 0x132   : > { %1467 = vset.pattern.permute.xlu0 %v1648_v44 }
 0x133   : > { %v503_v12 = vpop.permute.xlu1 %502  ;;  %1010 = vperm.xlu0 %1467, %v1797_v10  }
 0x134   : > { %533 = vst.msk [vmem:[#allocation2 + $0x10] sm:$0xff] %vm530_vm6, %v503_v12 }
 0x135   : > { %v565_v13 = vpop.permute.xlu2 %564  ;;  %755 = vperm.xlu1 %1453, %v1778_v6  }
 0x136   : > { %591 = vst.msk [vmem:[#allocation2 + $0x18] sm:$0xff] %vm587_vm7, %v565_v13  ;;  %1454 = vset.pattern.permute.xlu2 %v1644_v9  ;;  %v637_v45 = vpop.permute.xlu0 %636 }
 0x137   : > { %777 = vperm.xlu2 %1454, %v1766_v3   ;;  %651 = vst.msk [vmem:[#allocation2 + $0x30] sm:$0xff] %vm644_vm8, %v637_v45 }
 0x13b   : > { %v513_v15 = vpop.permute.xlu1 %512  ;;  %1035 = vperm.xlu0 %1467, %v1803_v11  }
 0x13c   : > { %535 = vst.msk [vmem:[#allocation2 + $0x20] sm:$0xff] %vm530_vm6, %v513_v15 }
 0x13d   : > { %v575_v16 = vpop.permute.xlu2 %574  ;;  %1456 = vset.pattern.permute.xlu1 %v1644_v9 }
 0x13e   : > { %593 = vst.msk [vmem:[#allocation2 + $0x28] sm:$0xff] %vm587_vm7, %v575_v16  ;;  %787 = vperm.xlu1 %1456, %v1758_v1  }
 0x13f   : > { %792 = vperm.xlu2 %1454, %v1770_v4   ;;  %v669_v48 = vpop.permute.xlu0 %668 }
 0x140   : > { %703 = vst.msk [vmem:[#allocation2 + $0x8] sm:$0xff] %vm701_vm9, %v669_v48 }
 0x143   : > { %v528_v18 = vpop.permute.xlu1 %527 }
 0x144   : > { %538 = vst.msk [vmem:[#allocation2 + $0x38] sm:$0xff] %vm530_vm6, %v528_v18 }
 0x146   : > { %v607_v20 = vpop.permute.xlu2 %606  ;;  %797 = vperm.xlu1 %1456, %v1761_v2  }
 0x147   : > { %645 = vst.msk [vmem:[#allocation2] sm:$0xff] %vm644_vm8, %v607_v20  ;;  %802 = vperm.xlu2 %1454, %v1773_v5   ;;  %v694_v50 = vpop.permute.xlu0 %693 }
 0x148   : > { %708 = vst.msk [vmem:[#allocation2 + $0x30] sm:$0xff] %vm701_vm9, %v694_v50 }
 0x14c   : > { %v560_v22 = vpop.permute.xlu1 %559 }
 0x14d   : > { %590 = vst.msk [vmem:[#allocation2 + $0x10] sm:$0xff] %vm587_vm7, %v560_v22 }
 0x14e   : > { %v622_v23 = vpop.permute.xlu2 %621  ;;  %812 = vperm.xlu1 %1456, %v1778_v6  }
 0x14f   : > { %648 = vst.msk [vmem:[#allocation2 + $0x18] sm:$0xff] %vm644_vm8, %v622_v23  ;;  %1457 = vset.pattern.permute.xlu2 %v1645_v19 }
 0x150   : > { %834 = vperm.xlu2 %1457, %v1766_v3   ;;  %v726_v52 = vpop.permute.xlu0 %725 }
 0x151   : > { %760 = vst.msk [vmem:[#allocation2 + $0x8] sm:$0xff] %vm758_vm10, %v726_v52 }
 0x154   : > { %v570_v25 = vpop.permute.xlu1 %569 }
 0x155   : > { %592 = vst.msk [vmem:[#allocation2 + $0x20] sm:$0xff] %vm587_vm7, %v570_v25 }
 0x156   : > { %v632_v27 = vpop.permute.xlu2 %631  ;;  %1459 = vset.pattern.permute.xlu1 %v1645_v19 }
 0x157   : > { %650 = vst.msk [vmem:[#allocation2 + $0x28] sm:$0xff] %vm644_vm8, %v632_v27  ;;  %844 = vperm.xlu1 %1459, %v1758_v1  }
 0x158   : > { %849 = vperm.xlu2 %1457, %v1770_v4   ;;  %v751_v55 = vpop.permute.xlu0 %750 }
 0x159   : > { %765 = vst.msk [vmem:[#allocation2 + $0x30] sm:$0xff] %vm758_vm10, %v751_v55 }
 0x15c   : > { %v585_v29 = vpop.permute.xlu1 %584 }
 0x15d   : > { %595 = vst.msk [vmem:[#allocation2 + $0x38] sm:$0xff] %vm587_vm7, %v585_v29 }
 0x15f   : > { %v664_v30 = vpop.permute.xlu2 %663  ;;  %854 = vperm.xlu1 %1459, %v1761_v2  }
 0x160   : > { %702 = vst.msk [vmem:[#allocation2] sm:$0xff] %vm701_vm9, %v664_v30  ;;  %859 = vperm.xlu2 %1457, %v1773_v5  }
 0x161   : > { %v783_v57 = vpop.permute.xlu0 %782 }
 0x162   : > { %817 = vst.msk [vmem:[#allocation2 + $0x8] sm:$0xff] %vm815_vm11, %v783_v57 }
 0x165   : > { %v617_v32 = vpop.permute.xlu1 %616 }
 0x166   : > { %647 = vst.msk [vmem:[#allocation2 + $0x10] sm:$0xff] %vm644_vm8, %v617_v32 }
 0x167   : > { %v679_v33 = vpop.permute.xlu2 %678  ;;  %869 = vperm.xlu1 %1459, %v1778_v6  }
 0x168   : > { %705 = vst.msk [vmem:[#allocation2 + $0x18] sm:$0xff] %vm701_vm9, %v679_v33  ;;  %1460 = vset.pattern.permute.xlu2 %v1646_v26 }
 0x169   : > { %891 = vperm.xlu2 %1460, %v1766_v3   ;;  %v808_v58 = vpop.permute.xlu0 %807 }
 0x16a   : > { %822 = vst.msk [vmem:[#allocation2 + $0x30] sm:$0xff] %vm815_vm11, %v808_v58 }
 0x16d   : > { %v627_v36 = vpop.permute.xlu1 %626 }
 0x16e   : > { %649 = vst.msk [vmem:[#allocation2 + $0x20] sm:$0xff] %vm644_vm8, %v627_v36 }
 0x16f   : > { %v689_v37 = vpop.permute.xlu2 %688  ;;  %1462 = vset.pattern.permute.xlu1 %v1646_v26 }
 0x170   : > { %707 = vst.msk [vmem:[#allocation2 + $0x28] sm:$0xff] %vm701_vm9, %v689_v37  ;;  %901 = vperm.xlu1 %1462, %v1758_v1  }
 0x171   : > { %906 = vperm.xlu2 %1460, %v1770_v4  }
 0x175   : > { %v642_v39 = vpop.permute.xlu1 %641 }
 0x176   : > { %652 = vst.msk [vmem:[#allocation2 + $0x38] sm:$0xff] %vm644_vm8, %v642_v39 }
 0x178   : > { %v721_v40 = vpop.permute.xlu2 %720  ;;  %911 = vperm.xlu1 %1462, %v1761_v2  }
 0x179   : > { %759 = vst.msk [vmem:[#allocation2] sm:$0xff] %vm758_vm10, %v721_v40  ;;  %916 = vperm.xlu2 %1460, %v1773_v5  }
 0x17e   : > { %v674_v42 = vpop.permute.xlu1 %673 }
 0x17f   : > { %704 = vst.msk [vmem:[#allocation2 + $0x10] sm:$0xff] %vm701_vm9, %v674_v42 }
 0x180   : > { %v736_v43 = vpop.permute.xlu2 %735  ;;  %926 = vperm.xlu1 %1462, %v1778_v6  }
 0x181   : > { %762 = vst.msk [vmem:[#allocation2 + $0x18] sm:$0xff] %vm758_vm10, %v736_v43  ;;  %1463 = vset.pattern.permute.xlu2 %v1647_v34 }
 0x182   : > { %948 = vperm.xlu2 %1463, %v1766_v3  }
 0x186   : > { %v684_v46 = vpop.permute.xlu1 %683 }
 0x187   : > { %706 = vst.msk [vmem:[#allocation2 + $0x20] sm:$0xff] %vm701_vm9, %v684_v46 }
 0x188   : > { %v746_v47 = vpop.permute.xlu2 %745  ;;  %1465 = vset.pattern.permute.xlu1 %v1647_v34 }
 0x189   : > { %764 = vst.msk [vmem:[#allocation2 + $0x28] sm:$0xff] %vm758_vm10, %v746_v47  ;;  %958 = vperm.xlu1 %1465, %v1758_v1  }
 0x18a   : > { %963 = vperm.xlu2 %1463, %v1770_v4  }
 0x18e   : > { %v699_v10 = vpop.permute.xlu1 %698 }
 0x18f   : > { %709 = vst.msk [vmem:[#allocation2 + $0x38] sm:$0xff] %vm701_vm9, %v699_v10 }
 0x191   : > { %v778_v49 = vpop.permute.xlu2 %777  ;;  %968 = vperm.xlu1 %1465, %v1761_v2  }
 0x192   : > { %816 = vst.msk [vmem:[#allocation2] sm:$0xff] %vm815_vm11, %v778_v49  ;;  %973 = vperm.xlu2 %1463, %v1773_v5  }
 0x197   : > { %v731_v51 = vpop.permute.xlu1 %730 }
 0x198   : > { %761 = vst.msk [vmem:[#allocation2 + $0x10] sm:$0xff] %vm758_vm10, %v731_v51 }
 0x199   : > { %v793_v11 = vpop.permute.xlu2 %792  ;;  %983 = vperm.xlu1 %1465, %v1778_v6  }
 0x19a   : > { %819 = vst.msk [vmem:[#allocation2 + $0x18] sm:$0xff] %vm815_vm11, %v793_v11  ;;  %1466 = vset.pattern.permute.xlu2 %v1648_v44 }
 0x19b   : > { %1005 = vperm.xlu2 %1466, %v1766_v3  }
 0x19f   : > { %v741_v53 = vpop.permute.xlu1 %740 }
 0x1a0   : > { %763 = vst.msk [vmem:[#allocation2 + $0x20] sm:$0xff] %vm758_vm10, %v741_v53 }
 0x1a1   : > { %v803_v54 = vpop.permute.xlu2 %802  ;;  %1468 = vset.pattern.permute.xlu1 %v1648_v44 }
 0x1a2   : > { %821 = vst.msk [vmem:[#allocation2 + $0x28] sm:$0xff] %vm815_vm11, %v803_v54  ;;  %1015 = vperm.xlu1 %1468, %v1758_v1  }
 0x1a3   : > { %1020 = vperm.xlu2 %1466, %v1770_v4  }
 0x1a7   : > { %v756_v56 = vpop.permute.xlu1 %755 }
 0x1a8   : > { %766 = vst.msk [vmem:[#allocation2 + $0x38] sm:$0xff] %vm758_vm10, %v756_v56 }
 0x1aa   : > { %v835_v3 = vpop.permute.xlu2 %834  ;;  %1025 = vperm.xlu1 %1468, %v1761_v2  }
 0x1ab   : > { %873 = vst.msk [vmem:[#allocation2] sm:$0xff] %vm872_vm12, %v835_v3  ;;  %1030 = vperm.xlu2 %1466, %v1773_v5   ;;  %v840_v5 = vpop.permute.xlu0 %839 }
 0x1ac   : > { %874 = vst.msk [vmem:[#allocation2 + $0x8] sm:$0xff] %vm872_vm12, %v840_v5 }
 0x1b0   : > { %v788_v1 = vpop.permute.xlu1 %787 }
 0x1b1   : > { %818 = vst.msk [vmem:[#allocation2 + $0x10] sm:$0xff] %vm815_vm11, %v788_v1 }
 0x1b2   : > { %v850_v4 = vpop.permute.xlu2 %849  ;;  %1040 = vperm.xlu1 %1468, %v1778_v6  }
 0x1b3   : > { %876 = vst.msk [vmem:[#allocation2 + $0x18] sm:$0xff] %vm872_vm12, %v850_v4  ;;  %v865_v6 = vpop.permute.xlu0 %864 }
 0x1b4   : > { %879 = vst.msk [vmem:[#allocation2 + $0x30] sm:$0xff] %vm872_vm12, %v865_v6 }
 0x1b8   : > { %v798_v59 = vpop.permute.xlu1 %797 }
 0x1b9   : > { %820 = vst.msk [vmem:[#allocation2 + $0x20] sm:$0xff] %vm815_vm11, %v798_v59 }
 0x1ba   : > { %v860_v2 = vpop.permute.xlu2 %859 }
 0x1bb   : > { %878 = vst.msk [vmem:[#allocation2 + $0x28] sm:$0xff] %vm872_vm12, %v860_v2  ;;  %v897_v8 = vpop.permute.xlu0 %896 }
 0x1bc   : > { %931 = vst.msk [vmem:[#allocation2 + $0x8] sm:$0xff] %vm929_vm13, %v897_v8 }
 0x1c0   : > { %v813_v60 = vpop.permute.xlu1 %812 }
 0x1c1   : > { %823 = vst.msk [vmem:[#allocation2 + $0x38] sm:$0xff] %vm815_vm11, %v813_v60 }
 0x1c3   : > { %v892_v61 = vpop.permute.xlu2 %891  ;;  %v922_v12 = vpop.permute.xlu0 %921 }
 0x1c4   : > { %930 = vst.msk [vmem:[#allocation2] sm:$0xff] %vm929_vm13, %v892_v61 }
 0x1c5   : > { %936 = vst.msk [vmem:[#allocation2 + $0x30] sm:$0xff] %vm929_vm13, %v922_v12 }
 0x1c9   : > { %v845_v62 = vpop.permute.xlu1 %844 }
 0x1ca   : > { %875 = vst.msk [vmem:[#allocation2 + $0x10] sm:$0xff] %vm872_vm12, %v845_v62 }
 0x1cb   : > { %v907_v63 = vpop.permute.xlu2 %906  ;;  %v954_v16 = vpop.permute.xlu0 %953 }
 0x1cc   : > { %933 = vst.msk [vmem:[#allocation2 + $0x18] sm:$0xff] %vm929_vm13, %v907_v63 }
 0x1cd   : > { %988 = vst.msk [vmem:[#allocation2 + $0x8] sm:$0xff] %vm986_vm14, %v954_v16 }
 0x1d1   : > { %v855_v0 = vpop.permute.xlu1 %854 }
 0x1d2   : > { %877 = vst.msk [vmem:[#allocation2 + $0x20] sm:$0xff] %vm872_vm12, %v855_v0 }
 0x1d3   : > { %v917_v7 = vpop.permute.xlu2 %916  ;;  %v979_v19 = vpop.permute.xlu0 %978 }
 0x1d4   : > { %935 = vst.msk [vmem:[#allocation2 + $0x28] sm:$0xff] %vm929_vm13, %v917_v7 }
 0x1d5   : > { %993 = vst.msk [vmem:[#allocation2 + $0x30] sm:$0xff] %vm986_vm14, %v979_v19 }
 0x1d9   : > { %v870_v9 = vpop.permute.xlu1 %869 }
 0x1da   : > { %880 = vst.msk [vmem:[#allocation2 + $0x38] sm:$0xff] %vm872_vm12, %v870_v9 }
 0x1db   : > { %v1011_v34 = vpop.permute.xlu0 %1010 }
 0x1dc   : > { %v949_v13 = vpop.permute.xlu2 %948  ;;  %1045 = vst.msk [vmem:[#allocation2 + $0x8] sm:$0xff] %vm1043_vm15, %v1011_v34 }
 0x1dd   : > { %987 = vst.msk [vmem:[#allocation2] sm:$0xff] %vm986_vm14, %v949_v13 }
 0x1e2   : > { %v902_v14 = vpop.permute.xlu1 %901 }
 0x1e3   : > { %932 = vst.msk [vmem:[#allocation2 + $0x10] sm:$0xff] %vm929_vm13, %v902_v14  ;;  %v1501_v11 = vld [vmem:[#allocation2 + $0x8] ss:$0 sm:$0xff]  ;;  %v1502_v52 = vld [vmem:[#allocation2 + $0x9] ss:$0 sm:$0xff]  ;;  %v1036_v62 = vpop.permute.xlu0 %1035 }
 0x1e4   : > { %v964_v15 = vpop.permute.xlu2 %963  ;;  %v1503_v53 = vld [vmem:[#allocation2 + $0xa] ss:$0 sm:$0xff]  ;;  %v1504_v54 = vld [vmem:[#allocation2 + $0xb] ss:$0 sm:$0xff]  ;;  %1157 = vst.msk [vmem:[%s2029_s25 + $0x10] sm:$0x3] %vm1060_vm0, %v1501_v11 }
 0x1e5   : > { %990 = vst.msk [vmem:[#allocation2 + $0x18] sm:$0xff] %vm986_vm14, %v964_v15  ;;  %v1505_v55 = vld [vmem:[#allocation2 + $0xc] ss:$0 sm:$0xff]  ;;  %v1506_v56 = vld [vmem:[#allocation2 + $0xd] ss:$0 sm:$0xff] }
 0x1e6   : > { %1169 = vst.msk [vmem:[%s2029_s25 + $0x12] sm:$0x3] %vm1060_vm0, %v1502_v52  ;;  %v1507_v5 = vld [vmem:[#allocation2 + $0xe] ss:$0 sm:$0xff]  ;;  %v1508_v6 = vld [vmem:[#allocation2 + $0xf] ss:$0 sm:$0xff] }
 0x1e7   : > { %1181 = vst.msk [vmem:[%s2029_s25 + $0x14] sm:$0x3] %vm1060_vm0, %v1503_v53 }
 0x1e8   : > { %1193 = vst.msk [vmem:[%s2029_s25 + $0x16] sm:$0x3] %vm1060_vm0, %v1504_v54 }
 0x1e9   : > { %1205 = vst.msk [vmem:[%s2029_s25 + $0x18] sm:$0x3] %vm1060_vm0, %v1505_v55 }
 0x1ea   : > { %v912_v17 = vpop.permute.xlu1 %911  ;;  %1217 = vst.msk [vmem:[%s2029_s25 + $0x1a] sm:$0x3] %vm1060_vm0, %v1506_v56 }
 0x1eb   : > { %934 = vst.msk [vmem:[#allocation2 + $0x20] sm:$0xff] %vm929_vm13, %v912_v17 }
 0x1ec   : > { %v974_v18 = vpop.permute.xlu2 %973  ;;  %1229 = vst.msk [vmem:[%s2029_s25 + $0x1c] sm:$0x3] %vm1060_vm0, %v1507_v5 }
 0x1ed   : > { %992 = vst.msk [vmem:[#allocation2 + $0x28] sm:$0xff] %vm986_vm14, %v974_v18 }
 0x1ee   : > { %1241 = vst.msk [vmem:[%s2029_s25 + $0x1e] sm:$0x3] %vm1060_vm0, %v1508_v6 }
 0x1ef   : > { %1050 = vst.msk [vmem:[#allocation2 + $0x30] sm:$0xff] %vm1043_vm15, %v1036_v62 }
 0x1f2   : > { %v927_v20 = vpop.permute.xlu1 %926 }
 0x1f3   : > { %937 = vst.msk [vmem:[#allocation2 + $0x38] sm:$0xff] %vm929_vm13, %v927_v20 }
 0x1f5   : > { %v1006_v21 = vpop.permute.xlu2 %1005 }
 0x1f6   : > { %1044 = vst.msk [vmem:[#allocation2] sm:$0xff] %vm1043_vm15, %v1006_v21  ;;  %v1517_v16 = vld [vmem:[#allocation2 + $0x30] ss:$0 sm:$0xff]  ;;  %v1518_v17 = vld [vmem:[#allocation2 + $0x31] ss:$0 sm:$0xff] }
 0x1f7   : > { %v1519_v18 = vld [vmem:[#allocation2 + $0x32] ss:$0 sm:$0xff]  ;;  %1064 = vst.msk [vmem:[%s2029_s25 + $0x60] sm:$0x3] %vm1060_vm0, %v1517_v16  ;;  %v1520_v19 = vld [vmem:[#allocation2 + $0x33] ss:$0 sm:$0xff] }
 0x1f8   : > { %1076 = vst.msk [vmem:[%s2029_s25 + $0x62] sm:$0x3] %vm1060_vm0, %v1518_v17  ;;  %v1521_v20 = vld [vmem:[#allocation2 + $0x34] ss:$0 sm:$0xff]  ;;  %v1522_v21 = vld [vmem:[#allocation2 + $0x35] ss:$0 sm:$0xff] }
 0x1f9   : > { %1088 = vst.msk [vmem:[%s2029_s25 + $0x64] sm:$0x3] %vm1060_vm0, %v1519_v18 }
 0x1fa   : > { %1100 = vst.msk [vmem:[%s2029_s25 + $0x66] sm:$0x3] %vm1060_vm0, %v1520_v19 }
 0x1fb   : > { %v959_v22 = vpop.permute.xlu1 %958  ;;  %1112 = vst.msk [vmem:[%s2029_s25 + $0x68] sm:$0x3] %vm1060_vm0, %v1521_v20 }
 0x1fc   : > { %989 = vst.msk [vmem:[#allocation2 + $0x10] sm:$0xff] %vm986_vm14, %v959_v22  ;;  %v1523_v22 = vld [vmem:[#allocation2 + $0x36] ss:$0 sm:$0xff] }
 0x1fd   : > { %v1469_v23 = vld [vmem:[#allocation2] ss:$0 sm:$0xff]  ;;  %v1021_v24 = vpop.permute.xlu2 %1020  ;;  %v1470_v25 = vld [vmem:[#allocation2 + $0x1] ss:$0 sm:$0xff]  ;;  %v1471_v26 = vld [vmem:[#allocation2 + $0x2] ss:$0 sm:$0xff] }
 0x1fe   : > { %1061 = vst.msk [vmem:[%s2029_s25] sm:$0x3] %vm1060_vm0, %v1469_v23  ;;  %v1472_v27 = vld [vmem:[#allocation2 + $0x3] ss:$0 sm:$0xff]  ;;  %v1473_v28 = vld [vmem:[#allocation2 + $0x4] ss:$0 sm:$0xff] }
 0x1ff   : > { %1073 = vst.msk [vmem:[%s2029_s25 + $0x2] sm:$0x3] %vm1060_vm0, %v1470_v25  ;;  %v1474_v29 = vld [vmem:[#allocation2 + $0x5] ss:$0 sm:$0xff]  ;;  %v1475_v30 = vld [vmem:[#allocation2 + $0x6] ss:$0 sm:$0xff] }
 0x200   : > { %1085 = vst.msk [vmem:[%s2029_s25 + $0x4] sm:$0x3] %vm1060_vm0, %v1471_v26  ;;  %v1476_v32 = vld [vmem:[#allocation2 + $0x7] ss:$0 sm:$0xff]  ;;  %v1524_v23 = vld [vmem:[#allocation2 + $0x37] ss:$0 sm:$0xff] }
 0x201   : > { %1097 = vst.msk [vmem:[%s2029_s25 + $0x6] sm:$0x3] %vm1060_vm0, %v1472_v27 }
 0x202   : > { %1109 = vst.msk [vmem:[%s2029_s25 + $0x8] sm:$0x3] %vm1060_vm0, %v1473_v28 }
 0x203   : > { %v969_v31 = vpop.permute.xlu1 %968  ;;  %1121 = vst.msk [vmem:[%s2029_s25 + $0xa] sm:$0x3] %vm1060_vm0, %v1474_v29 }
 0x204   : > { %991 = vst.msk [vmem:[#allocation2 + $0x20] sm:$0xff] %vm986_vm14, %v969_v31 }
 0x205   : > { %1133 = vst.msk [vmem:[%s2029_s25 + $0xc] sm:$0x3] %vm1060_vm0, %v1475_v30  ;;  %v1031_v33 = vpop.permute.xlu2 %1030 }
 0x206   : > { %1145 = vst.msk [vmem:[%s2029_s25 + $0xe] sm:$0x3] %vm1060_vm0, %v1476_v32 }
 0x207   : > { %1047 = vst.msk [vmem:[#allocation2 + $0x18] sm:$0xff] %vm1043_vm15, %v1021_v24 }
 0x208   : > { %1049 = vst.msk [vmem:[#allocation2 + $0x28] sm:$0xff] %vm1043_vm15, %v1031_v33 }
 0x209   : > { %1124 = vst.msk [vmem:[%s2029_s25 + $0x6a] sm:$0x3] %vm1060_vm0, %v1522_v21 }
 0x20a   : > { %1136 = vst.msk [vmem:[%s2029_s25 + $0x6c] sm:$0x3] %vm1060_vm0, %v1523_v22 }
 0x20b   : > { %v984_v35 = vpop.permute.xlu1 %983  ;;  %1148 = vst.msk [vmem:[%s2029_s25 + $0x6e] sm:$0x3] %vm1060_vm0, %v1524_v23 }
 0x20c   : > { %994 = vst.msk [vmem:[#allocation2 + $0x38] sm:$0xff] %vm986_vm14, %v984_v35 }
 0x20e   : > { %v1477_v36 = vld [vmem:[#allocation2 + $0x18] ss:$0 sm:$0xff]  ;;  %v1478_v37 = vld [vmem:[#allocation2 + $0x19] ss:$0 sm:$0xff]  ;;  %v1479_v38 = vld [vmem:[#allocation2 + $0x1a] ss:$0 sm:$0xff] }
 0x20f   : > { %1158 = vst.msk [vmem:[%s2029_s25 + $0x30] sm:$0x3] %vm1060_vm0, %v1477_v36  ;;  %v1480_v39 = vld [vmem:[#allocation2 + $0x1b] ss:$0 sm:$0xff]  ;;  %v1481_v40 = vld [vmem:[#allocation2 + $0x1c] ss:$0 sm:$0xff] }
 0x210   : > { %1170 = vst.msk [vmem:[%s2029_s25 + $0x32] sm:$0x3] %vm1060_vm0, %v1478_v37  ;;  %v1482_v41 = vld [vmem:[#allocation2 + $0x1d] ss:$0 sm:$0xff]  ;;  %v1483_v42 = vld [vmem:[#allocation2 + $0x1e] ss:$0 sm:$0xff] }
 0x211   : > { %1182 = vst.msk [vmem:[%s2029_s25 + $0x34] sm:$0x3] %vm1060_vm0, %v1479_v38  ;;  %v1484_v43 = vld [vmem:[#allocation2 + $0x1f] ss:$0 sm:$0xff]  ;;  %v1485_v44 = vld [vmem:[#allocation2 + $0x28] ss:$0 sm:$0xff] }
 0x212   : > { %1194 = vst.msk [vmem:[%s2029_s25 + $0x36] sm:$0x3] %vm1060_vm0, %v1480_v39  ;;  %v1486_v45 = vld [vmem:[#allocation2 + $0x29] ss:$0 sm:$0xff]  ;;  %v1487_v46 = vld [vmem:[#allocation2 + $0x2a] ss:$0 sm:$0xff] }
 0x213   : > { %1206 = vst.msk [vmem:[%s2029_s25 + $0x38] sm:$0x3] %vm1060_vm0, %v1481_v40  ;;  %v1488_v47 = vld [vmem:[#allocation2 + $0x2b] ss:$0 sm:$0xff]  ;;  %v1489_v48 = vld [vmem:[#allocation2 + $0x2c] ss:$0 sm:$0xff] }
 0x214   : > { %1218 = vst.msk [vmem:[%s2029_s25 + $0x3a] sm:$0x3] %vm1060_vm0, %v1482_v41  ;;  %v1490_v10 = vld [vmem:[#allocation2 + $0x2d] ss:$0 sm:$0xff]  ;;  %v1491_v49 = vld [vmem:[#allocation2 + $0x2e] ss:$0 sm:$0xff]  ;;  %v1016_v51 = vpop.permute.xlu1 %1015 }
 0x215   : > { %1230 = vst.msk [vmem:[%s2029_s25 + $0x3c] sm:$0x3] %vm1060_vm0, %v1483_v42  ;;  %v1492_v50 = vld [vmem:[#allocation2 + $0x2f] ss:$0 sm:$0xff] }
 0x216   : > { %1242 = vst.msk [vmem:[%s2029_s25 + $0x3e] sm:$0x3] %vm1060_vm0, %v1484_v43 }
 0x217   : > { %1159 = vst.msk [vmem:[%s2029_s25 + $0x50] sm:$0x3] %vm1060_vm0, %v1485_v44 }
 0x218   : > { %1171 = vst.msk [vmem:[%s2029_s25 + $0x52] sm:$0x3] %vm1060_vm0, %v1486_v45 }
 0x219   : > { %1183 = vst.msk [vmem:[%s2029_s25 + $0x54] sm:$0x3] %vm1060_vm0, %v1487_v46 }
 0x21a   : > { %1195 = vst.msk [vmem:[%s2029_s25 + $0x56] sm:$0x3] %vm1060_vm0, %v1488_v47 }
 0x21b   : > { %1207 = vst.msk [vmem:[%s2029_s25 + $0x58] sm:$0x3] %vm1060_vm0, %v1489_v48 }
 0x21c   : > { %1219 = vst.msk [vmem:[%s2029_s25 + $0x5a] sm:$0x3] %vm1060_vm0, %v1490_v10  ;;  %v1026_v4 = vpop.permute.xlu1 %1025 }
 0x21d   : > { %1231 = vst.msk [vmem:[%s2029_s25 + $0x5c] sm:$0x3] %vm1060_vm0, %v1491_v49 }
 0x21e   : > { %1243 = vst.msk [vmem:[%s2029_s25 + $0x5e] sm:$0x3] %vm1060_vm0, %v1492_v50 }
 0x21f   : > { %1046 = vst.msk [vmem:[#allocation2 + $0x10] sm:$0xff] %vm1043_vm15, %v1016_v51 }
 0x220   : > { %1048 = vst.msk [vmem:[#allocation2 + $0x20] sm:$0xff] %vm1043_vm15, %v1026_v4 }
 0x224   : > { %v1041_v63 = vpop.permute.xlu1 %1040 }
 0x225   : > { %1051 = vst.msk [vmem:[#allocation2 + $0x38] sm:$0xff] %vm1043_vm15, %v1041_v63 }
 0x226   : > { %v1493_v3 = vld [vmem:[#allocation2 + $0x10] ss:$0 sm:$0xff]  ;;  %v1494_v57 = vld [vmem:[#allocation2 + $0x11] ss:$0 sm:$0xff]  ;;  %v1495_v1 = vld [vmem:[#allocation2 + $0x12] ss:$0 sm:$0xff] }
 0x227   : > { %1062 = vst.msk [vmem:[%s2029_s25 + $0x20] sm:$0x3] %vm1060_vm0, %v1493_v3  ;;  %v1496_v58 = vld [vmem:[#allocation2 + $0x13] ss:$0 sm:$0xff]  ;;  %v1497_v59 = vld [vmem:[#allocation2 + $0x14] ss:$0 sm:$0xff] }
 0x228   : > { %1074 = vst.msk [vmem:[%s2029_s25 + $0x22] sm:$0x3] %vm1060_vm0, %v1494_v57  ;;  %v1498_v2 = vld [vmem:[#allocation2 + $0x15] ss:$0 sm:$0xff]  ;;  %v1499_v60 = vld [vmem:[#allocation2 + $0x16] ss:$0 sm:$0xff] }
 0x229   : > { %1086 = vst.msk [vmem:[%s2029_s25 + $0x24] sm:$0x3] %vm1060_vm0, %v1495_v1  ;;  %v1500_v61 = vld [vmem:[#allocation2 + $0x17] ss:$0 sm:$0xff]  ;;  %v1509_v0 = vld [vmem:[#allocation2 + $0x20] ss:$0 sm:$0xff] }
 0x22a   : > { %1098 = vst.msk [vmem:[%s2029_s25 + $0x26] sm:$0x3] %vm1060_vm0, %v1496_v58  ;;  %v1510_v7 = vld [vmem:[#allocation2 + $0x21] ss:$0 sm:$0xff]  ;;  %v1511_v8 = vld [vmem:[#allocation2 + $0x22] ss:$0 sm:$0xff] }
 0x22b   : > { %1110 = vst.msk [vmem:[%s2029_s25 + $0x28] sm:$0x3] %vm1060_vm0, %v1497_v59  ;;  %v1512_v9 = vld [vmem:[#allocation2 + $0x23] ss:$0 sm:$0xff]  ;;  %v1513_v12 = vld [vmem:[#allocation2 + $0x24] ss:$0 sm:$0xff] }
 0x22c   : > { %1122 = vst.msk [vmem:[%s2029_s25 + $0x2a] sm:$0x3] %vm1060_vm0, %v1498_v2  ;;  %v1514_v13 = vld [vmem:[#allocation2 + $0x25] ss:$0 sm:$0xff]  ;;  %v1515_v14 = vld [vmem:[#allocation2 + $0x26] ss:$0 sm:$0xff] }
 0x22d   : > { %1134 = vst.msk [vmem:[%s2029_s25 + $0x2c] sm:$0x3] %vm1060_vm0, %v1499_v60  ;;  %v1516_v15 = vld [vmem:[#allocation2 + $0x27] ss:$0 sm:$0xff]  ;;  %v1525_v24 = vld [vmem:[#allocation2 + $0x38] ss:$0 sm:$0xff] }
 0x22e   : > { %1146 = vst.msk [vmem:[%s2029_s25 + $0x2e] sm:$0x3] %vm1060_vm0, %v1500_v61  ;;  %v1526_v25 = vld [vmem:[#allocation2 + $0x39] ss:$0 sm:$0xff]  ;;  %v1527_v26 = vld [vmem:[#allocation2 + $0x3a] ss:$0 sm:$0xff] }
 0x22f   : > { %1063 = vst.msk [vmem:[%s2029_s25 + $0x40] sm:$0x3] %vm1060_vm0, %v1509_v0  ;;  %v1528_v27 = vld [vmem:[#allocation2 + $0x3b] ss:$0 sm:$0xff]  ;;  %v1529_v28 = vld [vmem:[#allocation2 + $0x3c] ss:$0 sm:$0xff] }
 0x230   : > { %1075 = vst.msk [vmem:[%s2029_s25 + $0x42] sm:$0x3] %vm1060_vm0, %v1510_v7  ;;  %v1530_v29 = vld [vmem:[#allocation2 + $0x3d] ss:$0 sm:$0xff]  ;;  %v1531_v30 = vld [vmem:[#allocation2 + $0x3e] ss:$0 sm:$0xff] }
 0x231   : > { %1087 = vst.msk [vmem:[%s2029_s25 + $0x44] sm:$0x3] %vm1060_vm0, %v1511_v8  ;;  %v1532_v31 = vld [vmem:[#allocation2 + $0x3f] ss:$0 sm:$0xff] }
 0x232   : > { %1099 = vst.msk [vmem:[%s2029_s25 + $0x46] sm:$0x3] %vm1060_vm0, %v1512_v9 }
 0x233   : > { %1111 = vst.msk [vmem:[%s2029_s25 + $0x48] sm:$0x3] %vm1060_vm0, %v1513_v12 }
 0x234   : > { %1123 = vst.msk [vmem:[%s2029_s25 + $0x4a] sm:$0x3] %vm1060_vm0, %v1514_v13 }
 0x235   : > { %1135 = vst.msk [vmem:[%s2029_s25 + $0x4c] sm:$0x3] %vm1060_vm0, %v1515_v14 }
 0x236   : > { %1147 = vst.msk [vmem:[%s2029_s25 + $0x4e] sm:$0x3] %vm1060_vm0, %v1516_v15 }
 0x237   : > { %1160 = vst.msk [vmem:[%s2029_s25 + $0x70] sm:$0x3] %vm1060_vm0, %v1525_v24 }
 0x238   : > { %1172 = vst.msk [vmem:[%s2029_s25 + $0x72] sm:$0x3] %vm1060_vm0, %v1526_v25 }
 0x239   : > { %1184 = vst.msk [vmem:[%s2029_s25 + $0x74] sm:$0x3] %vm1060_vm0, %v1527_v26 }
 0x23a   : > { %1196 = vst.msk [vmem:[%s2029_s25 + $0x76] sm:$0x3] %vm1060_vm0, %v1528_v27 }
 0x23b   : > { %1208 = vst.msk [vmem:[%s2029_s25 + $0x78] sm:$0x3] %vm1060_vm0, %v1529_v28 }
 0x23c   : > { %1220 = vst.msk [vmem:[%s2029_s25 + $0x7a] sm:$0x3] %vm1060_vm0, %v1530_v29 }
 0x23d   : > { %1232 = vst.msk [vmem:[%s2029_s25 + $0x7c] sm:$0x3] %vm1060_vm0, %v1531_v30 }
 0x23e   : > { %1244 = vst.msk [vmem:[%s2029_s25 + $0x7e] sm:$0x3] %vm1060_vm0, %v1532_v31 }
 0x23f   : > { %1590 = shalt.err (!%p1587_p4)
}
 0x240   : > { %s1649_s20 = smov 128   ;;  %s1650_s21 = smov 8  }
 0x241   : > { %1357 = dma.vmem_to_hbm [thread:$0]  (%p1711_p11), %s1260_s30, 2048, %s1262_s2, %s1246_s10, %s1649_s20, %s1649_s20, %s1650_s21  }
 0x242 PF: > { %s1276_s22 = sand.u32 1, %s1617_s6   ;;  %p2216_p7 = scmp.ge.s32.totalorder %s1629_s9, 2 }
 0x243   : > { %s1277_s23 = scalar_lea.sflag [#allocation5], %s1276_s22 }
 0x244   : > { %p1364_p5 = pnand %p2216_p7, %p1715_p12 }
 0x246   : > { %p1365_p8 = pneg %p1364_p5 }
 0x248   : > { %1612 = dma.done.wait (%p1365_p8), %s1277_s23, 2048  }
 0x249   : > { %1614 = vsyncadd (%p1365_p8), %s1277_s23, 4294965248  ;;  %p14_p10 = scmp.ge.s32.totalorder %s1686_s12, 4   ;;  %s2217_s6 = smov %s1621_s7 }
 0x24a   : > { %s2218_s7 = smov %s1625_s8  ;;  %s2219_s8 = smov %s1698_s15 }
 0x24b   : > { %s2220_s9 = smov %s1686_s12  ;;  %16 = sbr.rel (!%p14_p10) target bundleno = 5 (0x5), region = 69 }
 0x250   :  { %1283 = vsyncpa [#allocation4], 1 }
 0x251   :  { %1285 = vsyncpa [#allocation4 + $0x1], 1 }
 0x252   :  { %1286 = vsyncpa [#allocation5], 1 }
 0x253   :  { %1288 = vsyncpa [#allocation5 + $0x1], 1 }

</bundles_post_ra>
